<compile_context>
chip_gen: v7x
topology: tpu7x:2x2x1
jax: 0.10.0
libtpu: 0.0.40
codegen_flags: <defaults>
</compile_context>

<pallas_src>
import functools

import jax
import jax.numpy as jnp
from jax import lax
from jax.experimental import pallas as pl
from jax.experimental.pallas import tpu as pltpu


# ------------------------- prologue: fused 1x1-conv projections ---------------

def _project_kernel(x_ref, wq_ref, wk_ref, wv_ref, bq_ref, bk_ref, bv_ref,
                    q_ref, k_ref, v_ref):
    """q/k/v = x @ W + b for one (tile, C) slab of tokens. Done once per token."""
    x = x_ref[...]                                            # (tp, C) bf16
    q = jnp.dot(x, wq_ref[...], preferred_element_type=jnp.float32) + bq_ref[...]
    k = jnp.dot(x, wk_ref[...], preferred_element_type=jnp.float32) + bk_ref[...]
    v = jnp.dot(x, wv_ref[...], preferred_element_type=jnp.float32) + bv_ref[...]
    q_ref[...] = q.astype(q_ref.dtype)
    k_ref[...] = k.astype(k_ref.dtype)
    v_ref[...] = v.astype(v_ref.dtype)


# ------------------------- attention: single-KV-pass fast path ----------------

def _attn_single_kernel(q_ref, k_ref, v_ref, xres_ref, gamma_ref, o_ref,
                        *, n_valid, mask_keys):
    """Whole (padded) KV axis in one step: plain softmax, no online rescale."""
    energy = lax.dot_general(                                 # (tq, n_pad)
        q_ref[...], k_ref[...],
        dimension_numbers=(((1,), (1,)), ((), ())),
        preferred_element_type=jnp.float32)
    if mask_keys:
        col = lax.broadcasted_iota(jnp.int32, energy.shape, 1)
        energy = jnp.where(col < n_valid, energy, -1e30)
    m = jnp.max(energy, axis=-1, keepdims=True)
    p = jnp.exp(energy - m)
    l = jnp.sum(p, axis=-1, keepdims=True)
    attn_v = jnp.dot(p.astype(jnp.bfloat16), v_ref[...],
                     preferred_element_type=jnp.float32)
    inv_l = pl.reciprocal(l, approx=True)                     # EUP reciprocal
    out = gamma_ref[0] * (attn_v * inv_l) + xres_ref[...].astype(jnp.float32)
    o_ref[...] = out.astype(o_ref.dtype)


# ------------------------- attention: flash (tiled KV) path -------------------

def _attn_flash_kernel(q_ref, k_ref, v_ref, xres_ref, gamma_ref, o_ref,
                       m_ref, l_ref, acc_ref, *, n_valid, tk, mask_keys):
    """Online-softmax over the KV grid axis; q/k/v are precomputed bf16."""
    ki = pl.program_id(2)

    @pl.when(ki == 0)
    def _():
        m_ref[...] = jnp.full_like(m_ref, -jnp.inf)
        l_ref[...] = jnp.zeros_like(l_ref)
        acc_ref[...] = jnp.zeros_like(acc_ref)

    energy = lax.dot_general(                                 # (tq, tk)
        q_ref[...], k_ref[...],
        dimension_numbers=(((1,), (1,)), ((), ())),
        preferred_element_type=jnp.float32)
    if mask_keys:
        col = ki * tk + lax.broadcasted_iota(jnp.int32, energy.shape, 1)
        energy = jnp.where(col < n_valid, energy, -1e30)

    m_prev = m_ref[...]
    m_new = jnp.maximum(m_prev, jnp.max(energy, axis=-1, keepdims=True))
    alpha = jnp.exp(m_prev - m_new)
    p = jnp.exp(energy - m_new)
    l_ref[...] = alpha * l_ref[...] + jnp.sum(p, axis=-1, keepdims=True)
    acc_ref[...] = alpha * acc_ref[...] + jnp.dot(
        p.astype(jnp.bfloat16), v_ref[...], preferred_element_type=jnp.float32)
    m_ref[...] = m_new

    @pl.when(ki == pl.num_programs(2) - 1)
    def _():
        inv_l = pl.reciprocal(l_ref[...], approx=True)        # EUP reciprocal
        out = (gamma_ref[0] * (acc_ref[...] * inv_l)
               + xres_ref[...].astype(jnp.float32))           # gamma*attn + x
        o_ref[...] = out.astype(o_ref.dtype)


# --------------------------------- wrapper -------------------------------------

def _round_up(x, m):
    return -(-x // m) * m


def self_attention_forward(x_nchw, params, *, tq=512, tk=512):
    """Fused Self_Attention forward. x_nchw: (B, C, H, W) -> (B, C, H, W)."""
    B, C, H, W = x_nchw.shape
    N = H * W
    C8 = params["wq"].shape[0]

    # NCHW -> lane-dense (B, N, C) token layout, bf16 (halves HBM reads).
    # TODO(synk): accepting NHWC at the module boundary would remove these two
    # full HBM round-trip transposes entirely.
    x_tok = (jnp.transpose(x_nchw, (0, 2, 3, 1))
             .reshape(B, N, C).astype(jnp.bfloat16))

    # 1x1-conv weights as (C_in, C_out) matmul operands; bf16 for the MXU.
    wq = jnp.transpose(params["wq"].reshape(C8, C)).astype(jnp.bfloat16)
    wk = jnp.transpose(params["wk"].reshape(C8, C)).astype(jnp.bfloat16)
    wv = jnp.transpose(params["wv"].reshape(C, C)).astype(jnp.bfloat16)
    bq = params["bq"].reshape(1, C8).astype(jnp.float32)
    bk = params["bk"].reshape(1, C8).astype(jnp.float32)
    bv = params["bv"].reshape(1, C).astype(jnp.float32)
    gamma = params["gamma"].reshape(1).astype(jnp.float32)

    # ---- tile selection + padding (never de-tile; mask padded keys) ----
    SINGLE_PASS_MAX_N = 1024
    single_pass = N <= max(tk, SINGLE_PASS_MAX_N)
    if single_pass:
        tq = min(tq, N)
        if tq < N:
            tq = max(8, (tq // 8) * 8)
        n_pad = _round_up(N, tq)
        tk = n_pad                       # whole (padded) KV axis in one block
        num_kv = 1
    else:
        t = max(8, (min(tq, tk) // 8) * 8)
        tq = tk = t
        n_pad = _round_up(N, t)
        num_kv = n_pad // tk
    num_q = n_pad // tq
    mask_keys = n_pad != N

    if mask_keys:
        x_tok = jnp.pad(x_tok, ((0, 0), (0, n_pad - N), (0, 0)))

    vmem_limit = 32 * 1024 * 1024       # raises v5e's 16 MiB scoped default

    # ---- prologue: project q/k/v once over all tokens ----
    q_tok, k_tok, v_tok = pl.pallas_call(
        _project_kernel,
        out_shape=(jax.ShapeDtypeStruct((B, n_pad, C8), jnp.bfloat16),
                   jax.ShapeDtypeStruct((B, n_pad, C8), jnp.bfloat16),
                   jax.ShapeDtypeStruct((B, n_pad, C), jnp.bfloat16)),
        grid_spec=pltpu.PrefetchScalarGridSpec(
            num_scalar_prefetch=0,
            grid=(B, num_q),
            in_specs=[
                pl.BlockSpec((None, tq, C), lambda b, i: (b, i, 0)),   # x
                pl.BlockSpec((C, C8), lambda b, i: (0, 0)),            # Wq
                pl.BlockSpec((C, C8), lambda b, i: (0, 0)),            # Wk
                pl.BlockSpec((C, C), lambda b, i: (0, 0)),             # Wv
                pl.BlockSpec((1, C8), lambda b, i: (0, 0)),            # bq
                pl.BlockSpec((1, C8), lambda b, i: (0, 0)),            # bk
                pl.BlockSpec((1, C), lambda b, i: (0, 0)),             # bv
            ],
            out_specs=[
                pl.BlockSpec((None, tq, C8), lambda b, i: (b, i, 0)),
                pl.BlockSpec((None, tq, C8), lambda b, i: (b, i, 0)),
                pl.BlockSpec((None, tq, C), lambda b, i: (b, i, 0)),
            ]),
        compiler_params=pltpu.CompilerParams(
            dimension_semantics=("parallel", "parallel"),
            vmem_limit_bytes=vmem_limit),
    )(x_tok, wq, wk, wv, bq, bk, bv)

    # ---- attention (+ gamma * out + x epilogue) ----
    if single_pass:
        kernel = functools.partial(_attn_single_kernel,
                                   n_valid=N, mask_keys=mask_keys)
        out_tok = pl.pallas_call(
            kernel,
            out_shape=jax.ShapeDtypeStruct((B, n_pad, C), jnp.float32),
            grid_spec=pltpu.PrefetchScalarGridSpec(
                num_scalar_prefetch=0,
                grid=(B, num_q),
                in_specs=[
                    pl.BlockSpec((None, tq, C8), lambda b, qi: (b, qi, 0)),    # q
                    pl.BlockSpec((None, n_pad, C8), lambda b, qi: (b, 0, 0)),  # k (full)
                    pl.BlockSpec((None, n_pad, C), lambda b, qi: (b, 0, 0)),   # v (full)
                    pl.BlockSpec((None, tq, C), lambda b, qi: (b, qi, 0)),     # x residual
                    pl.BlockSpec(memory_space=pltpu.MemorySpace.SMEM),         # gamma
                ],
                out_specs=pl.BlockSpec((None, tq, C), lambda b, qi: (b, qi, 0))),
            compiler_params=pltpu.CompilerParams(
                dimension_semantics=("parallel", "parallel"),
                vmem_limit_bytes=vmem_limit),
        )(q_tok, k_tok, v_tok, x_tok, gamma)
    else:
        kernel = functools.partial(_attn_flash_kernel,
                                   n_valid=N, tk=tk, mask_keys=mask_keys)
        out_tok = pl.pallas_call(
            kernel,
            out_shape=jax.ShapeDtypeStruct((B, n_pad, C), jnp.float32),
            grid_spec=pltpu.PrefetchScalarGridSpec(
                num_scalar_prefetch=0,
                grid=(B, num_q, num_kv),
                in_specs=[
                    pl.BlockSpec((None, tq, C8), lambda b, qi, ki: (b, qi, 0)),  # q
                    pl.BlockSpec((None, tk, C8), lambda b, qi, ki: (b, ki, 0)),  # k
                    pl.BlockSpec((None, tk, C), lambda b, qi, ki: (b, ki, 0)),   # v
                    pl.BlockSpec((None, tq, C), lambda b, qi, ki: (b, qi, 0)),   # x residual
                    pl.BlockSpec(memory_space=pltpu.MemorySpace.SMEM),           # gamma
                ],
                out_specs=pl.BlockSpec((None, tq, C), lambda b, qi, ki: (b, qi, 0)),
                scratch_shapes=[
                    pltpu.VMEM((tq, 1), jnp.float32),   # running row max
                    pltpu.VMEM((tq, 1), jnp.float32),   # running denominator
                    pltpu.VMEM((tq, C), jnp.float32),   # running numerator (attn @ V)
                ]),
            compiler_params=pltpu.CompilerParams(
                dimension_semantics=("parallel", "parallel", "arbitrary"),
                vmem_limit_bytes=vmem_limit),
        )(q_tok, k_tok, v_tok, x_tok, gamma)

    out_tok = out_tok[:, :N, :]
    return jnp.transpose(out_tok.reshape(B, H, W, C), (0, 3, 1, 2))


# ----------------------------- pure-JAX reference -------------------------------

def self_attention_ref(x_nchw, params):
    """Literal transcription of the PyTorch forward (f32), for checking."""
    B, C, H, W = x_nchw.shape
    N = H * W
    x = x_nchw.reshape(B, C, N).astype(jnp.float32)
    wq = params["wq"].reshape(-1, C)
    wk = params["wk"].reshape(-1, C)
    wv = params["wv"].reshape(C, C)
    q = jnp.einsum("oc,bcn->bon", wq, x) + params["bq"][None, :, None]
    k = jnp.einsum("oc,bcn->bon", wk, x) + params["bk"][None, :, None]
    v = jnp.einsum("oc,bcn->bon", wv, x) + params["bv"][None, :, None]
    energy = jnp.einsum("bcn,bcm->bnm", q, k)            # proj_query^T @ proj_key
    attn = jax.nn.softmax(energy, axis=-1)
    out = jnp.einsum("bcm,bnm->bcn", v, attn).reshape(B, C, H, W)
    return params["gamma"][0] * out + x_nchw


# ------------------------------------- main -------------------------------------

if __name__ == "__main__":
    key = jax.random.PRNGKey(0)
    kx1, kx2, kq, kk, kv, kbq, kbk, kbv = jax.random.split(key, 8)

    # in_dim must be >= 8 (in_dim // 8 output channels); 128 keeps the channel
    # dim lane-dense on TPU.
    C = 128
    C8 = C // 8
    s = 0.05
    params = dict(
        wq=s * jax.random.normal(kq, (C8, C, 1, 1), jnp.float32),
        bq=s * jax.random.normal(kbq, (C8,), jnp.float32),
        wk=s * jax.random.normal(kk, (C8, C, 1, 1), jnp.float32),
        bk=s * jax.random.normal(kbk, (C8,), jnp.float32),
        wv=s * jax.random.normal(kv, (C, C, 1, 1), jnp.float32),
        bv=s * jax.random.normal(kbv, (C,), jnp.float32),
        # The module's __init__ sets gamma = 0 (output == x); use a nonzero
        # value here so the attention path is actually exercised by the check.
        gamma=jnp.full((1,), 0.7, jnp.float32),
    )

    fwd = jax.jit(self_attention_forward)

    # Case 1: small N=256 -> single-KV-pass fast path, no padding.
    x1 = jax.random.normal(kx1, (2, C, 16, 16), jnp.float32)
    out1 = fwd(x1, params)
    jax.block_until_ready(out1)
    ref1 = self_attention_ref(x1, params)
    assert out1.shape == x1.shape
    assert jnp.all(jnp.isfinite(out1))
    assert jnp.allclose(out1, ref1, atol=3e-2, rtol=3e-2), float(
        jnp.max(jnp.abs(out1 - ref1)))

    # Case 2: N=1225 (not a multiple of 512) -> padded flash path with key masking.
    x2 = jax.random.normal(kx2, (1, C, 35, 35), jnp.float32)
    out2 = fwd(x2, params)
    jax.block_until_ready(out2)
    ref2 = self_attention_ref(x2, params)
    assert out2.shape == x2.shape
    assert jnp.all(jnp.isfinite(out2))
    assert jnp.allclose(out2, ref2, atol=3e-2, rtol=3e-2), float(
        jnp.max(jnp.abs(out2 - ref2)))

    print("KERNEL_OK")
</pallas_src>

<mosaic_0001>
module attributes {stable_mosaic.version = 11 : i64} {
  func.func @_project_kernel(%arg0: i32, %arg1: i32, %arg2: memref<1x256x128xbf16, #tpu.memory_space<vmem>>, %arg3: memref<128x16xbf16, #tpu.memory_space<vmem>>, %arg4: memref<128x16xbf16, #tpu.memory_space<vmem>>, %arg5: memref<128x128xbf16, #tpu.memory_space<vmem>>, %arg6: memref<1x16xf32, #tpu.memory_space<vmem>>, %arg7: memref<1x16xf32, #tpu.memory_space<vmem>>, %arg8: memref<1x128xf32, #tpu.memory_space<vmem>>, %arg9: memref<1x256x16xbf16, #tpu.memory_space<vmem>>, %arg10: memref<1x256x16xbf16, #tpu.memory_space<vmem>>, %arg11: memref<1x256x128xbf16, #tpu.memory_space<vmem>>) attributes {dimension_semantics = [#tpu.dimension_semantics<parallel>, #tpu.dimension_semantics<parallel>], iteration_bounds = array<i64: 2, 1>, scalar_prefetch = 0 : i64, scratch_operands = 0 : i64, tpu.core_type = #tpu.core_type<tc>, window_params = [{transform_indices = @transform_0, window_bounds = array<i64: 1, 256, 128>}, {pipeline_mode = #tpu.pipeline_mode<synchronous>, transform_indices = @transform_1, window_bounds = array<i64: 128, 16>}, {pipeline_mode = #tpu.pipeline_mode<synchronous>, transform_indices = @transform_2, window_bounds = array<i64: 128, 16>}, {pipeline_mode = #tpu.pipeline_mode<synchronous>, transform_indices = @transform_3, window_bounds = array<i64: 128, 128>}, {pipeline_mode = #tpu.pipeline_mode<synchronous>, transform_indices = @transform_4, window_bounds = array<i64: 1, 16>}, {pipeline_mode = #tpu.pipeline_mode<synchronous>, transform_indices = @transform_5, window_bounds = array<i64: 1, 16>}, {pipeline_mode = #tpu.pipeline_mode<synchronous>, transform_indices = @transform_6, window_bounds = array<i64: 1, 128>}, {transform_indices = @transform_7, window_bounds = array<i64: 1, 256, 16>}, {transform_indices = @transform_8, window_bounds = array<i64: 1, 256, 16>}, {transform_indices = @transform_9, window_bounds = array<i64: 1, 256, 128>}]} {
    %c0 = arith.constant 0 : index
    %c0_0 = arith.constant 0 : index
    %c0_1 = arith.constant 0 : index
    %0 = vector.load %arg2[%c0, %c0_0, %c0_1] : memref<1x256x128xbf16, #tpu.memory_space<vmem>>, vector<1x256x128xbf16>
    %1 = vector.shape_cast %0 : vector<1x256x128xbf16> to vector<256x128xbf16>
    %c0_2 = arith.constant 0 : index
    %c0_3 = arith.constant 0 : index
    %2 = vector.load %arg3[%c0_2, %c0_3] : memref<128x16xbf16, #tpu.memory_space<vmem>>, vector<128x16xbf16>
    %cst = arith.constant dense<0.000000e+00> : vector<256x16xf32>
    %3 = tpu.matmul %1, %2, %cst {dimension_numbers = #tpu.dot_dimension_numbers<[1], [0], [0], [1], [0, 0, 1, 1], [], []>} : vector<256x128xbf16>, vector<128x16xbf16>, vector<256x16xf32> -> vector<256x16xf32>
    %c0_4 = arith.constant 0 : index
    %c0_5 = arith.constant 0 : index
    %4 = vector.load %arg6[%c0_4, %c0_5] : memref<1x16xf32, #tpu.memory_space<vmem>>, vector<1x16xf32>
    %5 = vector.broadcast %4 : vector<1x16xf32> to vector<256x16xf32>
    %6 = arith.addf %3, %5 : vector<256x16xf32>
    %c0_6 = arith.constant 0 : index
    %c0_7 = arith.constant 0 : index
    %7 = vector.load %arg4[%c0_6, %c0_7] : memref<128x16xbf16, #tpu.memory_space<vmem>>, vector<128x16xbf16>
    %cst_8 = arith.constant dense<0.000000e+00> : vector<256x16xf32>
    %8 = tpu.matmul %1, %7, %cst_8 {dimension_numbers = #tpu.dot_dimension_numbers<[1], [0], [0], [1], [0, 0, 1, 1], [], []>} : vector<256x128xbf16>, vector<128x16xbf16>, vector<256x16xf32> -> vector<256x16xf32>
    %c0_9 = arith.constant 0 : index
    %c0_10 = arith.constant 0 : index
    %9 = vector.load %arg7[%c0_9, %c0_10] : memref<1x16xf32, #tpu.memory_space<vmem>>, vector<1x16xf32>
    %10 = vector.broadcast %9 : vector<1x16xf32> to vector<256x16xf32>
    %11 = arith.addf %8, %10 : vector<256x16xf32>
    %c0_11 = arith.constant 0 : index
    %c0_12 = arith.constant 0 : index
    %12 = vector.load %arg5[%c0_11, %c0_12] : memref<128x128xbf16, #tpu.memory_space<vmem>>, vector<128x128xbf16>
    %cst_13 = arith.constant dense<0.000000e+00> : vector<256x128xf32>
    %13 = tpu.matmul %1, %12, %cst_13 {dimension_numbers = #tpu.dot_dimension_numbers<[1], [0], [0], [1], [0, 0, 1, 1], [], []>} : vector<256x128xbf16>, vector<128x128xbf16>, vector<256x128xf32> -> vector<256x128xf32>
    %c0_14 = arith.constant 0 : index
    %c0_15 = arith.constant 0 : index
    %14 = vector.load %arg8[%c0_14, %c0_15] : memref<1x128xf32, #tpu.memory_space<vmem>>, vector<1x128xf32>
    %15 = vector.broadcast %14 : vector<1x128xf32> to vector<256x128xf32>
    %16 = arith.addf %13, %15 : vector<256x128xf32>
    %17 = arith.truncf %6 : vector<256x16xf32> to vector<256x16xbf16>
    %c0_16 = arith.constant 0 : index
    %c0_17 = arith.constant 0 : index
    %c0_18 = arith.constant 0 : index
    %18 = vector.load %arg9[%c0_16, %c0_17, %c0_18] : memref<1x256x16xbf16, #tpu.memory_space<vmem>>, vector<1x256x16xbf16>
    %19 = vector.shape_cast %18 : vector<1x256x16xbf16> to vector<256x16xbf16>
    %20 = vector.shape_cast %17 : vector<256x16xbf16> to vector<1x256x16xbf16>
    tpu.vector_store %arg9[%c0_16, %c0_17, %c0_18], %20 {strides = array<i32>} : memref<1x256x16xbf16, #tpu.memory_space<vmem>>, vector<1x256x16xbf16>,
    %21 = arith.truncf %11 : vector<256x16xf32> to vector<256x16xbf16>
    %c0_19 = arith.constant 0 : index
    %c0_20 = arith.constant 0 : index
    %c0_21 = arith.constant 0 : index
    %22 = vector.load %arg10[%c0_19, %c0_20, %c0_21] : memref<1x256x16xbf16, #tpu.memory_space<vmem>>, vector<1x256x16xbf16>
    %23 = vector.shape_cast %22 : vector<1x256x16xbf16> to vector<256x16xbf16>
    %24 = vector.shape_cast %21 : vector<256x16xbf16> to vector<1x256x16xbf16>
    tpu.vector_store %arg10[%c0_19, %c0_20, %c0_21], %24 {strides = array<i32>} : memref<1x256x16xbf16, #tpu.memory_space<vmem>>, vector<1x256x16xbf16>,
    %25 = arith.truncf %16 : vector<256x128xf32> to vector<256x128xbf16>
    %c0_22 = arith.constant 0 : index
    %c0_23 = arith.constant 0 : index
    %c0_24 = arith.constant 0 : index
    %26 = vector.load %arg11[%c0_22, %c0_23, %c0_24] : memref<1x256x128xbf16, #tpu.memory_space<vmem>>, vector<1x256x128xbf16>
    %27 = vector.shape_cast %26 : vector<1x256x128xbf16> to vector<256x128xbf16>
    %28 = vector.shape_cast %25 : vector<256x128xbf16> to vector<1x256x128xbf16>
    tpu.vector_store %arg11[%c0_22, %c0_23, %c0_24], %28 {strides = array<i32>} : memref<1x256x128xbf16, #tpu.memory_space<vmem>>, vector<1x256x128xbf16>,
    return
  }
  func.func @transform_0(%arg0: i32, %arg1: i32) -> (i32, i32, i32) {
    %c0_i32 = arith.constant 0 : i32
    %c0_i32_0 = arith.constant 0 : i32
    return %arg0, %arg1, %c0_i32 : i32, i32, i32
  }
  func.func @transform_1(%arg0: i32, %arg1: i32) -> (i32, i32) {
    %c0_i32 = arith.constant 0 : i32
    %c0_i32_0 = arith.constant 0 : i32
    %c0_i32_1 = arith.constant 0 : i32
    return %c0_i32, %c0_i32_0 : i32, i32
  }
  func.func @transform_2(%arg0: i32, %arg1: i32) -> (i32, i32) {
    %c0_i32 = arith.constant 0 : i32
    %c0_i32_0 = arith.constant 0 : i32
    %c0_i32_1 = arith.constant 0 : i32
    return %c0_i32, %c0_i32_0 : i32, i32
  }
  func.func @transform_3(%arg0: i32, %arg1: i32) -> (i32, i32) {
    %c0_i32 = arith.constant 0 : i32
    %c0_i32_0 = arith.constant 0 : i32
    %c0_i32_1 = arith.constant 0 : i32
    return %c0_i32, %c0_i32_0 : i32, i32
  }
  func.func @transform_4(%arg0: i32, %arg1: i32) -> (i32, i32) {
    %c0_i32 = arith.constant 0 : i32
    %c0_i32_0 = arith.constant 0 : i32
    %c0_i32_1 = arith.constant 0 : i32
    return %c0_i32, %c0_i32_0 : i32, i32
  }
  func.func @transform_5(%arg0: i32, %arg1: i32) -> (i32, i32) {
    %c0_i32 = arith.constant 0 : i32
    %c0_i32_0 = arith.constant 0 : i32
    %c0_i32_1 = arith.constant 0 : i32
    return %c0_i32, %c0_i32_0 : i32, i32
  }
  func.func @transform_6(%arg0: i32, %arg1: i32) -> (i32, i32) {
    %c0_i32 = arith.constant 0 : i32
    %c0_i32_0 = arith.constant 0 : i32
    %c0_i32_1 = arith.constant 0 : i32
    return %c0_i32, %c0_i32_0 : i32, i32
  }
  func.func @transform_7(%arg0: i32, %arg1: i32) -> (i32, i32, i32) {
    %c0_i32 = arith.constant 0 : i32
    %c0_i32_0 = arith.constant 0 : i32
    return %arg0, %arg1, %c0_i32 : i32, i32, i32
  }
  func.func @transform_8(%arg0: i32, %arg1: i32) -> (i32, i32, i32) {
    %c0_i32 = arith.constant 0 : i32
    %c0_i32_0 = arith.constant 0 : i32
    return %arg0, %arg1, %c0_i32 : i32, i32, i32
  }
  func.func @transform_9(%arg0: i32, %arg1: i32) -> (i32, i32, i32) {
    %c0_i32 = arith.constant 0 : i32
    %c0_i32_0 = arith.constant 0 : i32
    return %arg0, %arg1, %c0_i32 : i32, i32, i32
  }
}

module attributes {stable_mosaic.version = 11 : i64} {
  func.func @_attn_single_kernel(%arg0: i32, %arg1: i32, %arg2: memref<1x256x16xbf16, #tpu.memory_space<vmem>>, %arg3: memref<1x256x16xbf16, #tpu.memory_space<vmem>>, %arg4: memref<1x256x128xbf16, #tpu.memory_space<vmem>>, %arg5: memref<1x256x128xbf16, #tpu.memory_space<vmem>>, %arg6: memref<1xf32, #tpu.memory_space<smem>>, %arg7: memref<1x256x128xf32, #tpu.memory_space<vmem>>) attributes {dimension_semantics = [#tpu.dimension_semantics<parallel>, #tpu.dimension_semantics<parallel>], iteration_bounds = array<i64: 2, 1>, scalar_prefetch = 0 : i64, scratch_operands = 0 : i64, tpu.core_type = #tpu.core_type<tc>, window_params = [{transform_indices = @transform_0, window_bounds = array<i64: 1, 256, 16>}, {transform_indices = @transform_1, window_bounds = array<i64: 1, 256, 16>}, {transform_indices = @transform_2, window_bounds = array<i64: 1, 256, 128>}, {transform_indices = @transform_3, window_bounds = array<i64: 1, 256, 128>}, {transform_indices = @transform_4, window_bounds = array<i64: 1>}, {transform_indices = @transform_5, window_bounds = array<i64: 1, 256, 128>}]} {
    %c0 = arith.constant 0 : index
    %c0_0 = arith.constant 0 : index
    %c0_1 = arith.constant 0 : index
    %0 = vector.load %arg2[%c0, %c0_0, %c0_1] : memref<1x256x16xbf16, #tpu.memory_space<vmem>>, vector<1x256x16xbf16>
    %1 = vector.shape_cast %0 : vector<1x256x16xbf16> to vector<256x16xbf16>
    %c0_2 = arith.constant 0 : index
    %c0_3 = arith.constant 0 : index
    %c0_4 = arith.constant 0 : index
    %2 = vector.load %arg3[%c0_2, %c0_3, %c0_4] : memref<1x256x16xbf16, #tpu.memory_space<vmem>>, vector<1x256x16xbf16>
    %3 = vector.shape_cast %2 : vector<1x256x16xbf16> to vector<256x16xbf16>
    %cst = arith.constant dense<0.000000e+00> : vector<256x256xf32>
    %4 = tpu.matmul %1, %3, %cst {dimension_numbers = #tpu.dot_dimension_numbers<[1], [1], [0], [0], [0, 0, 1, 0], [], []>} : vector<256x16xbf16>, vector<256x16xbf16>, vector<256x256xf32> -> vector<256x256xf32>
    %cst_5 = arith.constant dense<0xFF800000> : vector<256xf32>
    %5 = vector.multi_reduction <maximumf>, %4, %cst_5 [1] : vector<256x256xf32> to vector<256xf32>
    %6 = vector.shape_cast %5 : vector<256xf32> to vector<256x1xf32>
    %7 = vector.broadcast %6 : vector<256x1xf32> to vector<256x256xf32>
    %8 = arith.subf %4, %7 : vector<256x256xf32>
    %9 = math.exp %8 : vector<256x256xf32>
    %cst_6 = arith.constant dense<0.000000e+00> : vector<256xf32>
    %10 = vector.multi_reduction <add>, %9, %cst_6 [1] : vector<256x256xf32> to vector<256xf32>
    %11 = vector.shape_cast %10 : vector<256xf32> to vector<256x1xf32>
    %12 = arith.truncf %9 : vector<256x256xf32> to vector<256x256xbf16>
    %c0_7 = arith.constant 0 : index
    %c0_8 = arith.constant 0 : index
    %c0_9 = arith.constant 0 : index
    %13 = vector.load %arg4[%c0_7, %c0_8, %c0_9] : memref<1x256x128xbf16, #tpu.memory_space<vmem>>, vector<1x256x128xbf16>
    %14 = vector.shape_cast %13 : vector<1x256x128xbf16> to vector<256x128xbf16>
    %cst_10 = arith.constant dense<0.000000e+00> : vector<256x128xf32>
    %15 = tpu.matmul %12, %14, %cst_10 {dimension_numbers = #tpu.dot_dimension_numbers<[1], [0], [0], [1], [0, 0, 1, 1], [], []>} : vector<256x256xbf16>, vector<256x128xbf16>, vector<256x128xf32> -> vector<256x128xf32>
    %16 = tpu.reciprocal %11 {approx = true} : vector<256x1xf32> -> vector<256x1xf32>
    %c0_11 = arith.constant 0 : index
    %17 = memref.load %arg6[%c0_11] : memref<1xf32, #tpu.memory_space<smem>>
    %18 = vector.broadcast %16 : vector<256x1xf32> to vector<256x128xf32>
    %19 = arith.mulf %15, %18 : vector<256x128xf32>
    %20 = vector.broadcast %17 : f32 to vector<256x128xf32>
    %21 = arith.mulf %20, %19 : vector<256x128xf32>
    %c0_12 = arith.constant 0 : index
    %c0_13 = arith.constant 0 : index
    %c0_14 = arith.constant 0 : index
    %22 = vector.load %arg5[%c0_12, %c0_13, %c0_14] : memref<1x256x128xbf16, #tpu.memory_space<vmem>>, vector<1x256x128xbf16>
    %23 = vector.shape_cast %22 : vector<1x256x128xbf16> to vector<256x128xbf16>
    %24 = arith.extf %23 : vector<256x128xbf16> to vector<256x128xf32>
    %25 = arith.addf %21, %24 : vector<256x128xf32>
    %c0_15 = arith.constant 0 : index
    %c0_16 = arith.constant 0 : index
    %c0_17 = arith.constant 0 : index
    %26 = vector.load %arg7[%c0_15, %c0_16, %c0_17] : memref<1x256x128xf32, #tpu.memory_space<vmem>>, vector<1x256x128xf32>
    %27 = vector.shape_cast %26 : vector<1x256x128xf32> to vector<256x128xf32>
    %28 = vector.shape_cast %25 : vector<256x128xf32> to vector<1x256x128xf32>
    tpu.vector_store %arg7[%c0_15, %c0_16, %c0_17], %28 {strides = array<i32>} : memref<1x256x128xf32, #tpu.memory_space<vmem>>, vector<1x256x128xf32>,
    return
  }
  func.func @transform_0(%arg0: i32, %arg1: i32) -> (i32, i32, i32) {
    %c0_i32 = arith.constant 0 : i32
    %c0_i32_0 = arith.constant 0 : i32
    return %arg0, %arg1, %c0_i32 : i32, i32, i32
  }
  func.func @transform_1(%arg0: i32, %arg1: i32) -> (i32, i32, i32) {
    %c0_i32 = arith.constant 0 : i32
    %c0_i32_0 = arith.constant 0 : i32
    %c0_i32_1 = arith.constant 0 : i32
    return %arg0, %c0_i32, %c0_i32_0 : i32, i32, i32
  }
  func.func @transform_2(%arg0: i32, %arg1: i32) -> (i32, i32, i32) {
    %c0_i32 = arith.constant 0 : i32
    %c0_i32_0 = arith.constant 0 : i32
    %c0_i32_1 = arith.constant 0 : i32
    return %arg0, %c0_i32, %c0_i32_0 : i32, i32, i32
  }
  func.func @transform_3(%arg0: i32, %arg1: i32) -> (i32, i32, i32) {
    %c0_i32 = arith.constant 0 : i32
    %c0_i32_0 = arith.constant 0 : i32
    return %arg0, %arg1, %c0_i32 : i32, i32, i32
  }
  func.func @transform_4(%arg0: i32, %arg1: i32) -> i32 {
    %c0_i32 = arith.constant 0 : i32
    %c0_i32_0 = arith.constant 0 : i32
    return %c0_i32 : i32
  }
  func.func @transform_5(%arg0: i32, %arg1: i32) -> (i32, i32, i32) {
    %c0_i32 = arith.constant 0 : i32
    %c0_i32_0 = arith.constant 0 : i32
    return %arg0, %arg1, %c0_i32 : i32, i32, i32
  }
}

</mosaic_0001>

<bundles_post_ra>
// kernel: self_attention_forward.2
= control target key start
LH: loop header
LB: loop body
LE: loop exit
PB: predicated region body
PF: predicated region fallthrough
CT: control target
= control target key end

     0   :  { %s2631_s30 = smov 0   ;;  %s2633_s10 = smov 0   ;;  %s3067_s0 = inlined_call_operand.vmem [shape: bf16[2,256,128], index: 0, kind: input, shape index: {}]   ;;  %s3068_s1 = inlined_call_operand.vmem [shape: bf16[128,16], index: 1, kind: input, shape index: {}]   ;;  %s3069_s2 = inlined_call_operand.vmem [shape: bf16[128,16], index: 2, kind: input, shape index: {}]   ;;  %s3070_s3 = inlined_call_operand.vmem [shape: bf16[128,128], index: 3, kind: input, shape index: {}]   ;;  %s3071_s4 = inlined_call_operand.vmem [shape: f32[1,16], index: 4, kind: input, shape index: {}]   ;;  %s3072_s5 = inlined_call_operand.vmem [shape: f32[1,16], index: 5, kind: input, shape index: {}]   ;;  %s3073_s6 = inlined_call_operand.vmem [shape: f32[1,128], index: 6, kind: input, shape index: {}]   ;;  %s3074_s7 = inlined_call_operand.vmem [shape: bf16[2,256,16], index: 7, kind: output, shape index: {0}]   ;;  %s3075_s8 = inlined_call_operand.vmem [shape: bf16[2,256,16], index: 8, kind: output, shape index: {1}]   ;;  %s3076_s9 = inlined_call_operand.vmem [shape: bf16[2,256,128], index: 9, kind: output, shape index: {2}]  }
   0x1   :  { %s2635_s11 = smov 0  }
   0x2 LB: > { %s32_s12 = sadd.s32 1, %s2575_s10  ;;  %p1916_p0 = scmp.ge.s32.totalorder %s2579_s11, 1  ;;  %s2579_s11 = sphi %s2635_s11, %s20_s11   ;;  %s2575_s10 = sphi %s2633_s10, %s3078_s10   ;;  %s2571_s30 = sphi %s2631_s30, %s3077_s30  }
   0x3   : > { %p34_p1 = scmp.ge.s32.totalorder %s32_s12, 2  ;;  %p317_p2 = scmp.lt.s32.totalorder %s2579_s11, 3 }
   0x5   : > { %s3080_s12 = smov (%p34_p1, %s32_s12), 0  ;;  %p318_p3 = pnand %p1916_p0, %p317_p2 }
   0x6   : > { %v2517_v0 = vld [vmem:[%s3068_s1] sm:$0xff] (!%p318_p3)   ;;  %p380_p4 = scmp.lt.s32.totalorder (!%p318_p3), %s2571_s30, 1  ;;  %v2518_v1 = vld [vmem:[%s3068_s1 + $0x8] sm:$0xff] (!%p318_p3)   ;;  %v2519_v2 = vld [vmem:[%s3068_s1 + $0x10] sm:$0xff] (!%p318_p3)   ;;  %vm1372_vm0 = vcmask (!%p318_p3), 125952  }
   0x7   : > { %321 = sbr.rel (%p318_p3) target bundleno = 347 (0x15b), region = 48  ;;  %2333 = vmatprep.subr.bf16.mxu0 (!%p318_p3), %v2517_v0  ;;  %2477 = vmatprep.subr.bf16.mxu1 (!%p318_p3), %v2517_v0  ;;  %v2520_v3 = vld [vmem:[%s3068_s1 + $0x18] sm:$0xff] (!%p318_p3)   ;;  %v2521_v6 = vld [vmem:[%s3068_s1 + $0x20] sm:$0xff] (!%p318_p3)   ;;  %v2522_v7 = vld [vmem:[%s3068_s1 + $0x28] sm:$0xff] (!%p318_p3)  }
   0x8   : > { %2334 = vmatpush3.bf16.msra.mxu0 (!%p318_p3), %v2517_v0  ;;  %2485 = vmatpush3.bf16.msra.mxu1 (!%p318_p3), %v2517_v0  ;;  %v2523_v8 = vld [vmem:[%s3068_s1 + $0x30] sm:$0xff] (!%p318_p3)   ;;  %v2524_v9 = vld [vmem:[%s3068_s1 + $0x38] sm:$0xff] (!%p318_p3)   ;;  %v2529_v10 = vld [vmem:[%s3069_s2] sm:$0xff] (!%p318_p3)  }
   0x9   : > { %2335 = vmatprep.subr.bf16.mxu0 (!%p318_p3), %v2518_v1  ;;  %2478 = vmatprep.subr.bf16.mxu1 (!%p318_p3), %v2518_v1  ;;  %v2530_v12 = vld [vmem:[%s3070_s3] sm:$0xff] (!%p318_p3)   ;;  %v2531_v14 = vld [vmem:[%s3069_s2 + $0x8] sm:$0xff] (!%p318_p3)   ;;  %v2537_v18 = vld [vmem:[%s3069_s2 + $0x10] sm:$0xff] (!%p318_p3)  }
   0xa   : > { %v2532_v15 = vld [vmem:[%s3070_s3 + $0x8] sm:$0xff] (!%p318_p3)   ;;  %v2538_v19 = vld [vmem:[%s3070_s3 + $0x10] sm:$0xff] (!%p318_p3)   ;;  %v2539_v22 = vld [vmem:[%s3069_s2 + $0x18] sm:$0xff] (!%p318_p3)  }
   0xb   : > { %v2540_v23 = vld [vmem:[%s3070_s3 + $0x18] sm:$0xff] (!%p318_p3)   ;;  %v2545_v26 = vld [vmem:[%s3069_s2 + $0x20] sm:$0xff] (!%p318_p3)   ;;  %v2547_v30 = vld [vmem:[%s3069_s2 + $0x28] sm:$0xff] (!%p318_p3)  }
   0xc   : > { %2336 = vmatpush3.bf16.msra.mxu0 (!%p318_p3), %v2518_v1  ;;  %2486 = vmatpush3.bf16.msra.mxu1 (!%p318_p3), %v2518_v1  ;;  %v2546_v27 = vld [vmem:[%s3070_s3 + $0x20] sm:$0xff] (!%p318_p3)   ;;  %v2548_v31 = vld [vmem:[%s3070_s3 + $0x28] sm:$0xff] (!%p318_p3)   ;;  %v2553_v34 = vld [vmem:[%s3069_s2 + $0x30] sm:$0xff] (!%p318_p3)  }
   0xd   : > { %2337 = vmatprep.subr.bf16.mxu0 (!%p318_p3), %v2519_v2  ;;  %2479 = vmatprep.subr.bf16.mxu1 (!%p318_p3), %v2519_v2  ;;  %v2554_v35 = vld [vmem:[%s3070_s3 + $0x30] sm:$0xff] (!%p318_p3)   ;;  %v2555_v38 = vld [vmem:[%s3069_s2 + $0x38] sm:$0xff] (!%p318_p3)   ;;  %v2788_v40 = vld [vmem:[%s3071_s4] ss:$0 sm:$0xff] (!%p318_p3) }
   0xe   : > { %s3082_s30 = smov (!%p380_p4, %s2571_s30), 1  ;;  %v2556_v39 = vld [vmem:[%s3070_s3 + $0x38] sm:$0xff]  }
   0xf   : > { %s2658_s19 = sshll.u32 %s3082_s30, 7 }
  0x10   : > { %s2664_s22 = scalar_lea.vmem %s3067_s0, %s2658_s19  ;;  %2338 = vmatpush3.bf16.msra.mxu0 %v2519_v2  ;;  %2487 = vmatpush3.bf16.msra.mxu1 %v2519_v2  ;;  %s2796_s18 = scalar_lea.vmem %s3074_s7, %s2658_s19 }
  0x11   : > { %v2670_v4 = vld [vmem:[%s2664_s22] sm:$0xff]   ;;  %2339 = vmatprep.subr.bf16.mxu0 %v2520_v3  ;;  %2480 = vmatprep.subr.bf16.mxu1 %v2520_v3  ;;  %v2693_v11 = vld [vmem:[%s2664_s22 + $0x8] sm:$0xff]   ;;  %v2708_v16 = vld [vmem:[%s2664_s22 + $0x10] sm:$0xff]   ;;  %s2907_s27 = scalar_lea.vmem %s3075_s8, %s2658_s19  ;;  %s2918_s30 = scalar_lea.vmem %s3076_s9, %s2658_s19 }
  0x12   : > { %v2673_v5 = vld [vmem:[%s2664_s22 + $0x40] sm:$0xff]   ;;  %2349 = vmatprep.mubr.bf16.mxu0 %v2670_v4  ;;  %v2699_v13 = vld [vmem:[%s2664_s22 + $0x48] sm:$0xff]   ;;  %v2711_v17 = vld [vmem:[%s2664_s22 + $0x50] sm:$0xff]  }
  0x13   : > { %2365 = vmatprep.mubr.bf16.mxu1 %v2673_v5  ;;  %v2535_v20 = vld [vmem:[%s2664_s22 + $0x18] sm:$0xff]   ;;  %v2541_v24 = vld [vmem:[%s2664_s22 + $0x20] sm:$0xff]   ;;  %v2543_v28 = vld [vmem:[%s2664_s22 + $0x28] sm:$0xff]  }
  0x14   : > { %2340 = vmatpush3.bf16.msra.mxu0 %v2520_v3  ;;  %2488 = vmatpush3.bf16.msra.mxu1 %v2520_v3  ;;  %v2725_v21 = vld [vmem:[%s2664_s22 + $0x58] sm:$0xff]   ;;  %v2735_v25 = vld [vmem:[%s2664_s22 + $0x60] sm:$0xff]   ;;  %v2544_v29 = vld [vmem:[%s2664_s22 + $0x68] sm:$0xff]  }
  0x15   : > { %2341 = vmatprep.subr.bf16.mxu0 %v2521_v6  ;;  %2481 = vmatprep.subr.bf16.mxu1 %v2521_v6  ;;  %v2549_v32 = vld [vmem:[%s2664_s22 + $0x30] sm:$0xff]   ;;  %v2551_v36 = vld [vmem:[%s2664_s22 + $0x38] sm:$0xff]  }
  0x16   : > { %v2550_v33 = vld [vmem:[%s2664_s22 + $0x70] sm:$0xff]   ;;  %v2552_v37 = vld [vmem:[%s2664_s22 + $0x78] sm:$0xff]  }
  0x18   : > { %2342 = vmatpush3.bf16.msra.mxu0 %v2521_v6  ;;  %2489 = vmatpush3.bf16.msra.mxu1 %v2521_v6 }
  0x19   : > { %2343 = vmatprep.subr.bf16.mxu0 %v2522_v7  ;;  %2482 = vmatprep.subr.bf16.mxu1 %v2522_v7 }
  0x1c   : > { %2344 = vmatpush3.bf16.msra.mxu0 %v2522_v7  ;;  %2490 = vmatpush3.bf16.msra.mxu1 %v2522_v7 }
  0x1d   : > { %2345 = vmatprep.subr.bf16.mxu0 %v2523_v8  ;;  %2483 = vmatprep.subr.bf16.mxu1 %v2523_v8 }
  0x20   : > { %2346 = vmatpush3.bf16.msra.mxu0 %v2523_v8  ;;  %2491 = vmatpush3.bf16.msra.mxu1 %v2523_v8 }
  0x21   : > { %2347 = vmatprep.subr.bf16.mxu0 %v2524_v9  ;;  %2484 = vmatprep.subr.bf16.mxu1 %v2524_v9 }
  0x24   : > { %2348 = vmatpush3.bf16.msra.mxu0 %v2524_v9  ;;  %2492 = vmatpush3.bf16.msra.mxu1 %v2524_v9 }
  0x25   : > { %2381 = vmatprep.subr.bf16.mxu1 %v2529_v10  ;;  %2429 = vmatprep.subr.bf16.mxu0 %v2530_v12 }
  0x27   : > { %2350 = vmatmul.mubr.bf16.vlgmr.msra.gmra.mrb[0].mxu0 %v2693_v11  ;;  %2366 = vmatmul.mubr.bf16.vlgmr.msra.gmra.mrb[0].mxu1 %v2699_v13 }
  0x28   : > { %2382 = vmatpush3.bf16.msra.mxu1 %v2529_v10  ;;  %2430 = vmatpush3.bf16.msra.mxu0 %v2530_v12 }
  0x29   : > { %2383 = vmatprep.subr.bf16.mxu1 %v2531_v14  ;;  %2431 = vmatprep.subr.bf16.mxu0 %v2532_v15 }
  0x2a   : > { %2353 = vmatprep.mubr.bf16.mxu0 %v2708_v16  ;;  %2369 = vmatprep.mubr.bf16.mxu1 %v2711_v17 }
  0x2c   : > { %2384 = vmatpush3.bf16.msra.mxu1 %v2531_v14  ;;  %2432 = vmatpush3.bf16.msra.mxu0 %v2532_v15 }
  0x2d   : > { %2385 = vmatprep.subr.bf16.mxu1 %v2537_v18  ;;  %2433 = vmatprep.subr.bf16.mxu0 %v2538_v19 }
  0x2f   : > { %2354 = vmatmul.mubr.bf16.gmra.mrb[4].mxu0 %v2535_v20  ;;  %2370 = vmatmul.mubr.bf16.gmra.mrb[4].mxu1 %v2725_v21 }
  0x30   : > { %2386 = vmatpush3.bf16.msra.mxu1 %v2537_v18  ;;  %2434 = vmatpush3.bf16.msra.mxu0 %v2538_v19 }
  0x31   : > { %2387 = vmatprep.subr.bf16.mxu1 %v2539_v22  ;;  %2435 = vmatprep.subr.bf16.mxu0 %v2540_v23 }
  0x32   : > { %2357 = vmatprep.mubr.bf16.mxu0 %v2541_v24  ;;  %2373 = vmatprep.mubr.bf16.mxu1 %v2735_v25 }
  0x34   : > { %2388 = vmatpush3.bf16.msra.mxu1 %v2539_v22  ;;  %2436 = vmatpush3.bf16.msra.mxu0 %v2540_v23 }
  0x35   : > { %2389 = vmatprep.subr.bf16.mxu1 %v2545_v26  ;;  %2437 = vmatprep.subr.bf16.mxu0 %v2546_v27 }
  0x37   : > { %2358 = vmatmul.mubr.bf16.gmra.mrb[8].mxu0 %v2543_v28  ;;  %2374 = vmatmul.mubr.bf16.gmra.mrb[8].mxu1 %v2544_v29 }
  0x38   : > { %2390 = vmatpush3.bf16.msra.mxu1 %v2545_v26  ;;  %2438 = vmatpush3.bf16.msra.mxu0 %v2546_v27 }
  0x39   : > { %2391 = vmatprep.subr.bf16.mxu1 %v2547_v30  ;;  %2439 = vmatprep.subr.bf16.mxu0 %v2548_v31 }
  0x3a   : > { %2361 = vmatprep.mubr.bf16.mxu0 %v2549_v32  ;;  %2377 = vmatprep.mubr.bf16.mxu1 %v2550_v33 }
  0x3c   : > { %2392 = vmatpush3.bf16.msra.mxu1 %v2547_v30  ;;  %2440 = vmatpush3.bf16.msra.mxu0 %v2548_v31 }
  0x3d   : > { %2393 = vmatprep.subr.bf16.mxu1 %v2553_v34  ;;  %2441 = vmatprep.subr.bf16.mxu0 %v2554_v35 }
  0x3f   : > { %2362 = vmatmul.mubr.bf16.gmra.mrb[12].mxu0 %v2551_v36  ;;  %2378 = vmatmul.mubr.bf16.gmra.mrb[12].mxu1 %v2552_v37 }
  0x40   : > { %2394 = vmatpush3.bf16.msra.mxu1 %v2553_v34  ;;  %2442 = vmatpush3.bf16.msra.mxu0 %v2554_v35 }
  0x41   : > { %2395 = vmatprep.subr.bf16.mxu1 %v2555_v38  ;;  %2443 = vmatprep.subr.bf16.mxu0 %v2556_v39 }
  0x42   : > { %2397 = vmatprep.mubr.bf16.mxu1 %v2670_v4  ;;  %2445 = vmatprep.mubr.bf16.mxu0 %v2670_v4 }
  0x44   : > { %2396 = vmatpush3.bf16.msra.mxu1 %v2555_v38  ;;  %2444 = vmatpush3.bf16.msra.mxu0 %v2556_v39 }
  0x47   : > { %2398 = vmatmul.mubr.bf16.vlgmr.msra.gmra.mrb[16].mxu1 %v2693_v11  ;;  %2446 = vmatmul.mubr.bf16.vlgmr.msra.gmra.mrb[16].mxu0 %v2693_v11 }
  0x48   : > { %2401 = vmatprep.mubr.bf16.mxu1 %v2708_v16  ;;  %2449 = vmatprep.mubr.bf16.mxu0 %v2708_v16 }
  0x4f   : > { %2402 = vmatmul.mubr.bf16.gmra.mrb[20].mxu1 %v2535_v20  ;;  %2450 = vmatmul.mubr.bf16.gmra.mrb[20].mxu0 %v2535_v20 }
  0x50   : > { %2405 = vmatprep.mubr.bf16.mxu1 %v2541_v24  ;;  %2453 = vmatprep.mubr.bf16.mxu0 %v2541_v24 }
  0x57   : > { %2406 = vmatmul.mubr.bf16.gmra.mrb[24].mxu1 %v2543_v28  ;;  %2454 = vmatmul.mubr.bf16.gmra.mrb[24].mxu0 %v2543_v28 }
  0x58   : > { %2409 = vmatprep.mubr.bf16.mxu1 %v2549_v32  ;;  %2457 = vmatprep.mubr.bf16.mxu0 %v2549_v32 }
  0x5f   : > { %2410 = vmatmul.mubr.bf16.gmra.mrb[28].mxu1 %v2551_v36  ;;  %2458 = vmatmul.mubr.bf16.gmra.mrb[28].mxu0 %v2551_v36 }
  0x60   : > { %2413 = vmatprep.mubr.bf16.mxu1 %v2673_v5  ;;  %2461 = vmatprep.mubr.bf16.mxu0 %v2673_v5 }
  0x67   : > { %2414 = vmatmul.mubr.bf16.gmra.mrb[32].mxu1 %v2699_v13  ;;  %2462 = vmatmul.mubr.bf16.gmra.mrb[32].mxu0 %v2699_v13 }
  0x68   : > { %2417 = vmatprep.mubr.bf16.mxu1 %v2711_v17  ;;  %2465 = vmatprep.mubr.bf16.mxu0 %v2711_v17 }
  0x6f   : > { %2418 = vmatmul.mubr.bf16.gmra.mrb[36].mxu1 %v2725_v21  ;;  %2466 = vmatmul.mubr.bf16.gmra.mrb[36].mxu0 %v2725_v21 }
  0x70   : > { %2421 = vmatprep.mubr.bf16.mxu1 %v2735_v25  ;;  %2469 = vmatprep.mubr.bf16.mxu0 %v2735_v25 }
  0x77   : > { %2422 = vmatmul.mubr.bf16.gmra.mrb[40].mxu1 %v2544_v29  ;;  %2470 = vmatmul.mubr.bf16.gmra.mrb[40].mxu0 %v2544_v29 }
  0x78   : > { %2425 = vmatprep.mubr.bf16.mxu1 %v2550_v33  ;;  %2473 = vmatprep.mubr.bf16.mxu0 %v2550_v33 }
  0x7f   : > { %2426 = vmatmul.mubr.bf16.gmra.mrb[44].mxu1 %v2552_v37  ;;  %2474 = vmatmul.mubr.bf16.gmra.mrb[44].mxu0 %v2552_v37 }
  0xfa   : > { %v2351_v41 = vpop.f32.mrb[0].mxu0  ;;  %v2367_v42 = vpop.f32.mrb[0].mxu1 }
  0xfb   : > { %v662_v43 = vadd.f32 %v2351_v41, %v2788_v40  ;;  %v726_v44 = vadd.f32 %v2367_v42, %v2788_v40  ;;  %v653_v45 = vpop.f32.mrb[1].mxu0  ;;  %v717_v46 = vpop.f32.mrb[1].mxu1 }
  0xfc   : > { %v654_v47 = vadd.f32 %v2788_v40, %v653_v45  ;;  %v718_v48 = vadd.f32 %v2788_v40, %v717_v46  ;;  %v2352_v49 = vpop.f32.mrb[2].mxu0  ;;  %v2368_v50 = vpop.f32.mrb[2].mxu1 }
  0xfd   : > { %v2072_v51 = vpack.c.bf16 %v662_v43, %v662_v43  ;;  %v2088_v52 = vpack.c.bf16 %v726_v44, %v726_v44  ;;  %v665_v53 = vadd.f32 %v2352_v49, %v2788_v40  ;;  %v729_v54 = vadd.f32 %v2368_v50, %v2788_v40  ;;  %v656_v55 = vpop.f32.mrb[3].mxu0  ;;  %v720_v56 = vpop.f32.mrb[3].mxu1 }
  0xfe   : > { %v2070_v57 = vpack.c.bf16 %v654_v47, %v654_v47  ;;  %v2086_v58 = vpack.c.bf16 %v718_v48, %v718_v48  ;;  %v657_v59 = vadd.f32 %v2788_v40, %v656_v55  ;;  %v721_v60 = vadd.f32 %v2788_v40, %v720_v56 }
  0xff   : > { %1375 = vst.msk [vmem:[%s2796_s18 + $0x8] sm:$0xf] %vm1372_vm0, %v2072_v51  ;;  %1391 = vst.msk [vmem:[%s2796_s18 + $0x48] sm:$0xf] %vm1372_vm0, %v2088_v52  ;;  %v2073_v61 = vpack.c.bf16 %v665_v53, %v665_v53  ;;  %v2089_v62 = vpack.c.bf16 %v729_v54, %v729_v54 }
 0x100   : > { %1373 = vst.msk [vmem:[%s2796_s18] sm:$0xf] %vm1372_vm0, %v2070_v57  ;;  %1389 = vst.msk [vmem:[%s2796_s18 + $0x40] sm:$0xf] %vm1372_vm0, %v2086_v58  ;;  %v2071_v63 = vpack.c.bf16 %v657_v59, %v657_v59  ;;  %v2087_v0 = vpack.c.bf16 %v721_v60, %v721_v60 }
 0x101   : > { %1376 = vst.msk [vmem:[%s2796_s18 + $0xc] sm:$0xf] %vm1372_vm0, %v2073_v61  ;;  %1392 = vst.msk [vmem:[%s2796_s18 + $0x4c] sm:$0xf] %vm1372_vm0, %v2089_v62 }
 0x102   : > { %1374 = vst.msk [vmem:[%s2796_s18 + $0x4] sm:$0xf] %vm1372_vm0, %v2071_v63  ;;  %1390 = vst.msk [vmem:[%s2796_s18 + $0x44] sm:$0xf] %vm1372_vm0, %v2087_v0  ;;  %v2355_v1 = vpop.f32.mrb[4].mxu0  ;;  %v2371_v2 = vpop.f32.mrb[4].mxu1 }
 0x103   : > { %v678_v3 = vadd.f32 %v2355_v1, %v2788_v40  ;;  %v742_v4 = vadd.f32 %v2371_v2, %v2788_v40  ;;  %v669_v5 = vpop.f32.mrb[5].mxu0  ;;  %v733_v6 = vpop.f32.mrb[5].mxu1 }
 0x104   : > { %v670_v7 = vadd.f32 %v2788_v40, %v669_v5  ;;  %v734_v8 = vadd.f32 %v2788_v40, %v733_v6  ;;  %v2356_v9 = vpop.f32.mrb[6].mxu0  ;;  %v2372_v10 = vpop.f32.mrb[6].mxu1 }
 0x105   : > { %v2076_v11 = vpack.c.bf16 %v678_v3, %v678_v3  ;;  %v2092_v12 = vpack.c.bf16 %v742_v4, %v742_v4  ;;  %v681_v13 = vadd.f32 %v2356_v9, %v2788_v40  ;;  %v745_v14 = vadd.f32 %v2372_v10, %v2788_v40  ;;  %v672_v15 = vpop.f32.mrb[7].mxu0  ;;  %v736_v16 = vpop.f32.mrb[7].mxu1  ;;  %v2887_v10 = vld [vmem:[%s3072_s5] ss:$0 sm:$0xff] }
 0x106   : > { %v2074_v17 = vpack.c.bf16 %v670_v7, %v670_v7  ;;  %v2090_v18 = vpack.c.bf16 %v734_v8, %v734_v8  ;;  %v673_v19 = vadd.f32 %v2788_v40, %v672_v15  ;;  %v737_v20 = vadd.f32 %v2788_v40, %v736_v16 }
 0x107   : > { %1379 = vst.msk [vmem:[%s2796_s18 + $0x18] sm:$0xf] %vm1372_vm0, %v2076_v11  ;;  %1395 = vst.msk [vmem:[%s2796_s18 + $0x58] sm:$0xf] %vm1372_vm0, %v2092_v12  ;;  %v2077_v21 = vpack.c.bf16 %v681_v13, %v681_v13  ;;  %v2093_v22 = vpack.c.bf16 %v745_v14, %v745_v14  ;;  %v2900_v12 = vld [vmem:[%s3073_s6] ss:$0 sm:$0xff] }
 0x108   : > { %1377 = vst.msk [vmem:[%s2796_s18 + $0x10] sm:$0xf] %vm1372_vm0, %v2074_v17  ;;  %1393 = vst.msk [vmem:[%s2796_s18 + $0x50] sm:$0xf] %vm1372_vm0, %v2090_v18  ;;  %v2075_v23 = vpack.c.bf16 %v673_v19, %v673_v19  ;;  %v2091_v24 = vpack.c.bf16 %v737_v20, %v737_v20 }
 0x109   : > { %1380 = vst.msk [vmem:[%s2796_s18 + $0x1c] sm:$0xf] %vm1372_vm0, %v2077_v21  ;;  %1396 = vst.msk [vmem:[%s2796_s18 + $0x5c] sm:$0xf] %vm1372_vm0, %v2093_v22 }
 0x10a   : > { %1378 = vst.msk [vmem:[%s2796_s18 + $0x14] sm:$0xf] %vm1372_vm0, %v2075_v23  ;;  %1394 = vst.msk [vmem:[%s2796_s18 + $0x54] sm:$0xf] %vm1372_vm0, %v2091_v24  ;;  %v2359_v25 = vpop.f32.mrb[8].mxu0  ;;  %v2375_v26 = vpop.f32.mrb[8].mxu1 }
 0x10b   : > { %v694_v27 = vadd.f32 %v2359_v25, %v2788_v40  ;;  %v758_v28 = vadd.f32 %v2375_v26, %v2788_v40  ;;  %v685_v29 = vpop.f32.mrb[9].mxu0  ;;  %v749_v30 = vpop.f32.mrb[9].mxu1 }
 0x10c   : > { %v686_v31 = vadd.f32 %v2788_v40, %v685_v29  ;;  %v750_v32 = vadd.f32 %v2788_v40, %v749_v30  ;;  %v2360_v33 = vpop.f32.mrb[10].mxu0  ;;  %v2376_v34 = vpop.f32.mrb[10].mxu1 }
 0x10d   : > { %v2080_v35 = vpack.c.bf16 %v694_v27, %v694_v27  ;;  %v2096_v36 = vpack.c.bf16 %v758_v28, %v758_v28  ;;  %v697_v37 = vadd.f32 %v2360_v33, %v2788_v40  ;;  %v761_v38 = vadd.f32 %v2376_v34, %v2788_v40  ;;  %v688_v39 = vpop.f32.mrb[11].mxu0  ;;  %v752_v41 = vpop.f32.mrb[11].mxu1 }
 0x10e   : > { %v2078_v42 = vpack.c.bf16 %v686_v31, %v686_v31  ;;  %v2094_v43 = vpack.c.bf16 %v750_v32, %v750_v32  ;;  %v689_v44 = vadd.f32 %v2788_v40, %v688_v39  ;;  %v753_v45 = vadd.f32 %v2788_v40, %v752_v41 }
 0x10f   : > { %1383 = vst.msk [vmem:[%s2796_s18 + $0x28] sm:$0xf] %vm1372_vm0, %v2080_v35  ;;  %1399 = vst.msk [vmem:[%s2796_s18 + $0x68] sm:$0xf] %vm1372_vm0, %v2096_v36  ;;  %v2081_v46 = vpack.c.bf16 %v697_v37, %v697_v37  ;;  %v2097_v47 = vpack.c.bf16 %v761_v38, %v761_v38 }
 0x110   : > { %1381 = vst.msk [vmem:[%s2796_s18 + $0x20] sm:$0xf] %vm1372_vm0, %v2078_v42  ;;  %1397 = vst.msk [vmem:[%s2796_s18 + $0x60] sm:$0xf] %vm1372_vm0, %v2094_v43  ;;  %v2079_v48 = vpack.c.bf16 %v689_v44, %v689_v44  ;;  %v2095_v49 = vpack.c.bf16 %v753_v45, %v753_v45 }
 0x111   : > { %1384 = vst.msk [vmem:[%s2796_s18 + $0x2c] sm:$0xf] %vm1372_vm0, %v2081_v46  ;;  %1400 = vst.msk [vmem:[%s2796_s18 + $0x6c] sm:$0xf] %vm1372_vm0, %v2097_v47 }
 0x112   : > { %1382 = vst.msk [vmem:[%s2796_s18 + $0x24] sm:$0xf] %vm1372_vm0, %v2079_v48  ;;  %1398 = vst.msk [vmem:[%s2796_s18 + $0x64] sm:$0xf] %vm1372_vm0, %v2095_v49  ;;  %v2363_v50 = vpop.f32.mrb[12].mxu0  ;;  %v2379_v51 = vpop.f32.mrb[12].mxu1 }
 0x113   : > { %v710_v52 = vadd.f32 %v2363_v50, %v2788_v40  ;;  %v774_v53 = vadd.f32 %v2379_v51, %v2788_v40  ;;  %v701_v54 = vpop.f32.mrb[13].mxu0  ;;  %v765_v55 = vpop.f32.mrb[13].mxu1 }
 0x114   : > { %v702_v56 = vadd.f32 %v2788_v40, %v701_v54  ;;  %v766_v57 = vadd.f32 %v2788_v40, %v765_v55  ;;  %v2364_v58 = vpop.f32.mrb[14].mxu0  ;;  %v2380_v59 = vpop.f32.mrb[14].mxu1 }
 0x115   : > { %v2084_v60 = vpack.c.bf16 %v710_v52, %v710_v52  ;;  %v2100_v61 = vpack.c.bf16 %v774_v53, %v774_v53  ;;  %v713_v62 = vadd.f32 %v2364_v58, %v2788_v40  ;;  %v777_v63 = vadd.f32 %v2380_v59, %v2788_v40  ;;  %v704_v0 = vpop.f32.mrb[15].mxu0  ;;  %v768_v1 = vpop.f32.mrb[15].mxu1 }
 0x116   : > { %v2082_v2 = vpack.c.bf16 %v702_v56, %v702_v56  ;;  %v2098_v3 = vpack.c.bf16 %v766_v57, %v766_v57  ;;  %v705_v4 = vadd.f32 %v2788_v40, %v704_v0  ;;  %v769_v5 = vadd.f32 %v2788_v40, %v768_v1 }
 0x117   : > { %1387 = vst.msk [vmem:[%s2796_s18 + $0x38] sm:$0xf] %vm1372_vm0, %v2084_v60  ;;  %1403 = vst.msk [vmem:[%s2796_s18 + $0x78] sm:$0xf] %vm1372_vm0, %v2100_v61  ;;  %v2085_v6 = vpack.c.bf16 %v713_v62, %v713_v62  ;;  %v2101_v7 = vpack.c.bf16 %v777_v63, %v777_v63 }
 0x118   : > { %1385 = vst.msk [vmem:[%s2796_s18 + $0x30] sm:$0xf] %vm1372_vm0, %v2082_v2  ;;  %1401 = vst.msk [vmem:[%s2796_s18 + $0x70] sm:$0xf] %vm1372_vm0, %v2098_v3  ;;  %v2083_v8 = vpack.c.bf16 %v705_v4, %v705_v4  ;;  %v2099_v9 = vpack.c.bf16 %v769_v5, %v769_v5 }
 0x119   : > { %1388 = vst.msk [vmem:[%s2796_s18 + $0x3c] sm:$0xf] %vm1372_vm0, %v2085_v6  ;;  %1404 = vst.msk [vmem:[%s2796_s18 + $0x7c] sm:$0xf] %vm1372_vm0, %v2101_v7 }
 0x11a   : > { %1386 = vst.msk [vmem:[%s2796_s18 + $0x34] sm:$0xf] %vm1372_vm0, %v2083_v8  ;;  %1402 = vst.msk [vmem:[%s2796_s18 + $0x74] sm:$0xf] %vm1372_vm0, %v2099_v9  ;;  %v2399_v40 = vpop.f32.mrb[16].mxu1  ;;  %v2447_v11 = vpop.f32.mrb[16].mxu0 }
 0x11b   : > { %v894_v13 = vadd.f32 %v2399_v40, %v2887_v10  ;;  %v885_v14 = vpop.f32.mrb[17].mxu1  ;;  %v1117_v15 = vpop.f32.mrb[17].mxu0  ;;  %v1126_v20 = vadd.f32 %v2447_v11, %v2900_v12 }
 0x11c   : > { %v886_v16 = vadd.f32 %v2887_v10, %v885_v14  ;;  %v2400_v17 = vpop.f32.mrb[18].mxu1  ;;  %v2448_v18 = vpop.f32.mrb[18].mxu0  ;;  %v1118_v26 = vadd.f32 %v2900_v12, %v1117_v15 }
 0x11d   : > { %v2104_v19 = vpack.c.bf16 %v894_v13, %v894_v13  ;;  %v897_v21 = vadd.f32 %v2400_v17, %v2887_v10  ;;  %v1129_v22 = vadd.f32 %v2448_v18, %v2900_v12  ;;  %v888_v23 = vpop.f32.mrb[19].mxu1  ;;  %v1120_v24 = vpop.f32.mrb[19].mxu0 }
 0x11e   : > { %v2102_v25 = vpack.c.bf16 %v886_v16, %v886_v16  ;;  %v889_v27 = vadd.f32 %v2887_v10, %v888_v23  ;;  %v1121_v28 = vadd.f32 %v2900_v12, %v1120_v24 }
 0x11f   : > { %1535 = vst.msk [vmem:[%s2907_s27 + $0x8] sm:$0xf] %vm1372_vm0, %v2104_v19  ;;  %v2105_v29 = vpack.c.bf16 %v897_v21, %v897_v21  ;;  %v2174_v30 = vpack.c.bf16 %v1129_v22, %v1126_v20 }
 0x120   : > { %1533 = vst.msk [vmem:[%s2907_s27] sm:$0xf] %vm1372_vm0, %v2102_v25  ;;  %v2103_v31 = vpack.c.bf16 %v889_v27, %v889_v27  ;;  %v2169_v32 = vpack.c.bf16 %v1121_v28, %v1118_v26 }
 0x121   : > { %1536 = vst.msk [vmem:[%s2907_s27 + $0xc] sm:$0xf] %vm1372_vm0, %v2105_v29  ;;  %2246 = vst [vmem:[%s2918_s30 + $0x8] sm:$0xff] %v2174_v30  }
 0x122   : > { %1534 = vst.msk [vmem:[%s2907_s27 + $0x4] sm:$0xf] %vm1372_vm0, %v2103_v31  ;;  %2170 = vst [vmem:[%s2918_s30] sm:$0xff] %v2169_v32   ;;  %v2403_v33 = vpop.f32.mrb[20].mxu1  ;;  %v2451_v34 = vpop.f32.mrb[20].mxu0 }
 0x123   : > { %v910_v35 = vadd.f32 %v2403_v33, %v2887_v10  ;;  %v901_v36 = vpop.f32.mrb[21].mxu1  ;;  %v1133_v37 = vpop.f32.mrb[21].mxu0  ;;  %v1142_v43 = vadd.f32 %v2451_v34, %v2900_v12 }
 0x124   : > { %v902_v38 = vadd.f32 %v2887_v10, %v901_v36  ;;  %v2404_v39 = vpop.f32.mrb[22].mxu1  ;;  %v2452_v41 = vpop.f32.mrb[22].mxu0  ;;  %v1134_v49 = vadd.f32 %v2900_v12, %v1133_v37 }
 0x125   : > { %v2108_v42 = vpack.c.bf16 %v910_v35, %v910_v35  ;;  %v913_v44 = vadd.f32 %v2404_v39, %v2887_v10  ;;  %v1145_v45 = vadd.f32 %v2452_v41, %v2900_v12  ;;  %v904_v46 = vpop.f32.mrb[23].mxu1  ;;  %v1136_v47 = vpop.f32.mrb[23].mxu0 }
 0x126   : > { %v2106_v48 = vpack.c.bf16 %v902_v38, %v902_v38  ;;  %v905_v50 = vadd.f32 %v2887_v10, %v904_v46  ;;  %v1137_v51 = vadd.f32 %v2900_v12, %v1136_v47 }
 0x127   : > { %1539 = vst.msk [vmem:[%s2907_s27 + $0x18] sm:$0xf] %vm1372_vm0, %v2108_v42  ;;  %v2109_v52 = vpack.c.bf16 %v913_v44, %v913_v44  ;;  %v2184_v53 = vpack.c.bf16 %v1145_v45, %v1142_v43 }
 0x128   : > { %1537 = vst.msk [vmem:[%s2907_s27 + $0x10] sm:$0xf] %vm1372_vm0, %v2106_v48  ;;  %v2107_v54 = vpack.c.bf16 %v905_v50, %v905_v50  ;;  %v2179_v55 = vpack.c.bf16 %v1137_v51, %v1134_v49 }
 0x129   : > { %1540 = vst.msk [vmem:[%s2907_s27 + $0x1c] sm:$0xf] %vm1372_vm0, %v2109_v52  ;;  %2248 = vst [vmem:[%s2918_s30 + $0x18] sm:$0xff] %v2184_v53  }
 0x12a   : > { %1538 = vst.msk [vmem:[%s2907_s27 + $0x14] sm:$0xf] %vm1372_vm0, %v2107_v54  ;;  %2247 = vst [vmem:[%s2918_s30 + $0x10] sm:$0xff] %v2179_v55   ;;  %v2407_v56 = vpop.f32.mrb[24].mxu1  ;;  %v2455_v57 = vpop.f32.mrb[24].mxu0 }
 0x12b   : > { %v926_v58 = vadd.f32 %v2407_v56, %v2887_v10  ;;  %v917_v59 = vpop.f32.mrb[25].mxu1  ;;  %v1149_v60 = vpop.f32.mrb[25].mxu0  ;;  %v1158_v1 = vadd.f32 %v2455_v57, %v2900_v12 }
 0x12c   : > { %v918_v61 = vadd.f32 %v2887_v10, %v917_v59  ;;  %v2408_v62 = vpop.f32.mrb[26].mxu1  ;;  %v2456_v63 = vpop.f32.mrb[26].mxu0  ;;  %v1150_v7 = vadd.f32 %v2900_v12, %v1149_v60 }
 0x12d   : > { %v2112_v0 = vpack.c.bf16 %v926_v58, %v926_v58  ;;  %v929_v2 = vadd.f32 %v2408_v62, %v2887_v10  ;;  %v1161_v3 = vadd.f32 %v2456_v63, %v2900_v12  ;;  %v920_v4 = vpop.f32.mrb[27].mxu1  ;;  %v1152_v5 = vpop.f32.mrb[27].mxu0 }
 0x12e   : > { %v2110_v6 = vpack.c.bf16 %v918_v61, %v918_v61  ;;  %v921_v8 = vadd.f32 %v2887_v10, %v920_v4  ;;  %v1153_v9 = vadd.f32 %v2900_v12, %v1152_v5 }
 0x12f   : > { %1543 = vst.msk [vmem:[%s2907_s27 + $0x28] sm:$0xf] %vm1372_vm0, %v2112_v0  ;;  %v2113_v40 = vpack.c.bf16 %v929_v2, %v929_v2  ;;  %v2194_v11 = vpack.c.bf16 %v1161_v3, %v1158_v1 }
 0x130   : > { %1541 = vst.msk [vmem:[%s2907_s27 + $0x20] sm:$0xf] %vm1372_vm0, %v2110_v6  ;;  %v2111_v13 = vpack.c.bf16 %v921_v8, %v921_v8  ;;  %v2189_v14 = vpack.c.bf16 %v1153_v9, %v1150_v7 }
 0x131   : > { %1544 = vst.msk [vmem:[%s2907_s27 + $0x2c] sm:$0xf] %vm1372_vm0, %v2113_v40  ;;  %2250 = vst [vmem:[%s2918_s30 + $0x28] sm:$0xff] %v2194_v11  }
 0x132   : > { %1542 = vst.msk [vmem:[%s2907_s27 + $0x24] sm:$0xf] %vm1372_vm0, %v2111_v13  ;;  %2249 = vst [vmem:[%s2918_s30 + $0x20] sm:$0xff] %v2189_v14   ;;  %v2411_v15 = vpop.f32.mrb[28].mxu1  ;;  %v2459_v16 = vpop.f32.mrb[28].mxu0 }
 0x133   : > { %v942_v17 = vadd.f32 %v2411_v15, %v2887_v10  ;;  %v933_v18 = vpop.f32.mrb[29].mxu1  ;;  %v1165_v19 = vpop.f32.mrb[29].mxu0  ;;  %v1174_v24 = vadd.f32 %v2459_v16, %v2900_v12 }
 0x134   : > { %v934_v20 = vadd.f32 %v2887_v10, %v933_v18  ;;  %v2412_v21 = vpop.f32.mrb[30].mxu1  ;;  %v2460_v22 = vpop.f32.mrb[30].mxu0  ;;  %v1166_v30 = vadd.f32 %v2900_v12, %v1165_v19 }
 0x135   : > { %v2116_v23 = vpack.c.bf16 %v942_v17, %v942_v17  ;;  %v945_v25 = vadd.f32 %v2412_v21, %v2887_v10  ;;  %v1177_v26 = vadd.f32 %v2460_v22, %v2900_v12  ;;  %v936_v27 = vpop.f32.mrb[31].mxu1  ;;  %v1168_v28 = vpop.f32.mrb[31].mxu0 }
 0x136   : > { %v2114_v29 = vpack.c.bf16 %v934_v20, %v934_v20  ;;  %v937_v31 = vadd.f32 %v2887_v10, %v936_v27  ;;  %v1169_v32 = vadd.f32 %v2900_v12, %v1168_v28 }
 0x137   : > { %1547 = vst.msk [vmem:[%s2907_s27 + $0x38] sm:$0xf] %vm1372_vm0, %v2116_v23  ;;  %v2117_v33 = vpack.c.bf16 %v945_v25, %v945_v25  ;;  %v2204_v34 = vpack.c.bf16 %v1177_v26, %v1174_v24 }
 0x138   : > { %1545 = vst.msk [vmem:[%s2907_s27 + $0x30] sm:$0xf] %vm1372_vm0, %v2114_v29  ;;  %v2115_v35 = vpack.c.bf16 %v937_v31, %v937_v31  ;;  %v2199_v36 = vpack.c.bf16 %v1169_v32, %v1166_v30 }
 0x139   : > { %1548 = vst.msk [vmem:[%s2907_s27 + $0x3c] sm:$0xf] %vm1372_vm0, %v2117_v33  ;;  %2252 = vst [vmem:[%s2918_s30 + $0x38] sm:$0xff] %v2204_v34  }
 0x13a   : > { %1546 = vst.msk [vmem:[%s2907_s27 + $0x34] sm:$0xf] %vm1372_vm0, %v2115_v35  ;;  %2251 = vst [vmem:[%s2918_s30 + $0x30] sm:$0xff] %v2199_v36   ;;  %v2415_v37 = vpop.f32.mrb[32].mxu1  ;;  %v2463_v38 = vpop.f32.mrb[32].mxu0 }
 0x13b   : > { %v958_v39 = vadd.f32 %v2415_v37, %v2887_v10  ;;  %v949_v41 = vpop.f32.mrb[33].mxu1  ;;  %v1181_v42 = vpop.f32.mrb[33].mxu0  ;;  %v1190_v47 = vadd.f32 %v2463_v38, %v2900_v12 }
 0x13c   : > { %v950_v43 = vadd.f32 %v2887_v10, %v949_v41  ;;  %v2416_v44 = vpop.f32.mrb[34].mxu1  ;;  %v2464_v45 = vpop.f32.mrb[34].mxu0  ;;  %v1182_v53 = vadd.f32 %v2900_v12, %v1181_v42 }
 0x13d   : > { %v2120_v46 = vpack.c.bf16 %v958_v39, %v958_v39  ;;  %v961_v48 = vadd.f32 %v2416_v44, %v2887_v10  ;;  %v1193_v49 = vadd.f32 %v2464_v45, %v2900_v12  ;;  %v952_v50 = vpop.f32.mrb[35].mxu1  ;;  %v1184_v51 = vpop.f32.mrb[35].mxu0 }
 0x13e   : > { %v2118_v52 = vpack.c.bf16 %v950_v43, %v950_v43  ;;  %v953_v54 = vadd.f32 %v2887_v10, %v952_v50  ;;  %v1185_v55 = vadd.f32 %v2900_v12, %v1184_v51 }
 0x13f   : > { %1551 = vst.msk [vmem:[%s2907_s27 + $0x48] sm:$0xf] %vm1372_vm0, %v2120_v46  ;;  %v2121_v56 = vpack.c.bf16 %v961_v48, %v961_v48  ;;  %v2214_v57 = vpack.c.bf16 %v1193_v49, %v1190_v47 }
 0x140   : > { %1549 = vst.msk [vmem:[%s2907_s27 + $0x40] sm:$0xf] %vm1372_vm0, %v2118_v52  ;;  %v2119_v58 = vpack.c.bf16 %v953_v54, %v953_v54  ;;  %v2209_v59 = vpack.c.bf16 %v1185_v55, %v1182_v53 }
 0x141   : > { %1552 = vst.msk [vmem:[%s2907_s27 + $0x4c] sm:$0xf] %vm1372_vm0, %v2121_v56  ;;  %2254 = vst [vmem:[%s2918_s30 + $0x48] sm:$0xff] %v2214_v57  }
 0x142   : > { %1550 = vst.msk [vmem:[%s2907_s27 + $0x44] sm:$0xf] %vm1372_vm0, %v2119_v58  ;;  %2253 = vst [vmem:[%s2918_s30 + $0x40] sm:$0xff] %v2209_v59   ;;  %v2419_v60 = vpop.f32.mrb[36].mxu1  ;;  %v2467_v61 = vpop.f32.mrb[36].mxu0 }
 0x143   : > { %v974_v62 = vadd.f32 %v2419_v60, %v2887_v10  ;;  %v965_v63 = vpop.f32.mrb[37].mxu1  ;;  %v1197_v0 = vpop.f32.mrb[37].mxu0  ;;  %v1206_v5 = vadd.f32 %v2467_v61, %v2900_v12 }
 0x144   : > { %v966_v1 = vadd.f32 %v2887_v10, %v965_v63  ;;  %v2420_v2 = vpop.f32.mrb[38].mxu1  ;;  %v2468_v3 = vpop.f32.mrb[38].mxu0  ;;  %v1198_v11 = vadd.f32 %v2900_v12, %v1197_v0 }
 0x145   : > { %v2124_v4 = vpack.c.bf16 %v974_v62, %v974_v62  ;;  %v977_v6 = vadd.f32 %v2420_v2, %v2887_v10  ;;  %v1209_v7 = vadd.f32 %v2468_v3, %v2900_v12  ;;  %v968_v8 = vpop.f32.mrb[39].mxu1  ;;  %v1200_v9 = vpop.f32.mrb[39].mxu0 }
 0x146   : > { %v2122_v40 = vpack.c.bf16 %v966_v1, %v966_v1  ;;  %v969_v13 = vadd.f32 %v2887_v10, %v968_v8  ;;  %v1201_v14 = vadd.f32 %v2900_v12, %v1200_v9 }
 0x147   : > { %1555 = vst.msk [vmem:[%s2907_s27 + $0x58] sm:$0xf] %vm1372_vm0, %v2124_v4  ;;  %v2125_v15 = vpack.c.bf16 %v977_v6, %v977_v6  ;;  %v2224_v16 = vpack.c.bf16 %v1209_v7, %v1206_v5 }
 0x148   : > { %1553 = vst.msk [vmem:[%s2907_s27 + $0x50] sm:$0xf] %vm1372_vm0, %v2122_v40  ;;  %v2123_v17 = vpack.c.bf16 %v969_v13, %v969_v13  ;;  %v2219_v18 = vpack.c.bf16 %v1201_v14, %v1198_v11 }
 0x149   : > { %1556 = vst.msk [vmem:[%s2907_s27 + $0x5c] sm:$0xf] %vm1372_vm0, %v2125_v15  ;;  %2256 = vst [vmem:[%s2918_s30 + $0x58] sm:$0xff] %v2224_v16  }
 0x14a   : > { %1554 = vst.msk [vmem:[%s2907_s27 + $0x54] sm:$0xf] %vm1372_vm0, %v2123_v17  ;;  %2255 = vst [vmem:[%s2918_s30 + $0x50] sm:$0xff] %v2219_v18   ;;  %v2423_v19 = vpop.f32.mrb[40].mxu1  ;;  %v2471_v20 = vpop.f32.mrb[40].mxu0 }
 0x14b   : > { %v990_v21 = vadd.f32 %v2423_v19, %v2887_v10  ;;  %v981_v22 = vpop.f32.mrb[41].mxu1  ;;  %v1213_v23 = vpop.f32.mrb[41].mxu0  ;;  %v1222_v28 = vadd.f32 %v2471_v20, %v2900_v12 }
 0x14c   : > { %v982_v24 = vadd.f32 %v2887_v10, %v981_v22  ;;  %v2424_v25 = vpop.f32.mrb[42].mxu1  ;;  %v2472_v26 = vpop.f32.mrb[42].mxu0  ;;  %v1214_v34 = vadd.f32 %v2900_v12, %v1213_v23 }
 0x14d   : > { %v2128_v27 = vpack.c.bf16 %v990_v21, %v990_v21  ;;  %v993_v29 = vadd.f32 %v2424_v25, %v2887_v10  ;;  %v1225_v30 = vadd.f32 %v2472_v26, %v2900_v12  ;;  %v984_v31 = vpop.f32.mrb[43].mxu1  ;;  %v1216_v32 = vpop.f32.mrb[43].mxu0 }
 0x14e   : > { %v2126_v33 = vpack.c.bf16 %v982_v24, %v982_v24  ;;  %v985_v35 = vadd.f32 %v2887_v10, %v984_v31  ;;  %v1217_v36 = vadd.f32 %v2900_v12, %v1216_v32 }
 0x14f   : > { %1559 = vst.msk [vmem:[%s2907_s27 + $0x68] sm:$0xf] %vm1372_vm0, %v2128_v27  ;;  %v2129_v37 = vpack.c.bf16 %v993_v29, %v993_v29  ;;  %v2234_v38 = vpack.c.bf16 %v1225_v30, %v1222_v28 }
 0x150   : > { %1557 = vst.msk [vmem:[%s2907_s27 + $0x60] sm:$0xf] %vm1372_vm0, %v2126_v33  ;;  %v2127_v39 = vpack.c.bf16 %v985_v35, %v985_v35  ;;  %v2229_v41 = vpack.c.bf16 %v1217_v36, %v1214_v34 }
 0x151   : > { %1560 = vst.msk [vmem:[%s2907_s27 + $0x6c] sm:$0xf] %vm1372_vm0, %v2129_v37  ;;  %2258 = vst [vmem:[%s2918_s30 + $0x68] sm:$0xff] %v2234_v38  }
 0x152   : > { %1558 = vst.msk [vmem:[%s2907_s27 + $0x64] sm:$0xf] %vm1372_vm0, %v2127_v39  ;;  %2257 = vst [vmem:[%s2918_s30 + $0x60] sm:$0xff] %v2229_v41   ;;  %v2427_v42 = vpop.f32.mrb[44].mxu1  ;;  %v2475_v43 = vpop.f32.mrb[44].mxu0 }
 0x153   : > { %v1006_v44 = vadd.f32 %v2427_v42, %v2887_v10  ;;  %v997_v45 = vpop.f32.mrb[45].mxu1  ;;  %v1229_v46 = vpop.f32.mrb[45].mxu0  ;;  %v1238_v51 = vadd.f32 %v2475_v43, %v2900_v12 }
 0x154   : > { %v998_v47 = vadd.f32 %v2887_v10, %v997_v45  ;;  %v2428_v48 = vpop.f32.mrb[46].mxu1  ;;  %v2476_v49 = vpop.f32.mrb[46].mxu0  ;;  %v1230_v57 = vadd.f32 %v2900_v12, %v1229_v46 }
 0x155   : > { %v2132_v50 = vpack.c.bf16 %v1006_v44, %v1006_v44  ;;  %v1009_v52 = vadd.f32 %v2428_v48, %v2887_v10  ;;  %v1241_v53 = vadd.f32 %v2476_v49, %v2900_v12  ;;  %v1000_v54 = vpop.f32.mrb[47].mxu1  ;;  %v1232_v55 = vpop.f32.mrb[47].mxu0 }
 0x156   : > { %v2130_v56 = vpack.c.bf16 %v998_v47, %v998_v47  ;;  %v1001_v58 = vadd.f32 %v2887_v10, %v1000_v54  ;;  %v1233_v59 = vadd.f32 %v2900_v12, %v1232_v55 }
 0x157   : > { %1563 = vst.msk [vmem:[%s2907_s27 + $0x78] sm:$0xf] %vm1372_vm0, %v2132_v50  ;;  %v2133_v60 = vpack.c.bf16 %v1009_v52, %v1009_v52  ;;  %v2244_v61 = vpack.c.bf16 %v1241_v53, %v1238_v51 }
 0x158   : > { %1561 = vst.msk [vmem:[%s2907_s27 + $0x70] sm:$0xf] %vm1372_vm0, %v2130_v56  ;;  %v2131_v62 = vpack.c.bf16 %v1001_v58, %v1001_v58  ;;  %v2239_v63 = vpack.c.bf16 %v1233_v59, %v1230_v57 }
 0x159   : > { %1564 = vst.msk [vmem:[%s2907_s27 + $0x7c] sm:$0xf] %vm1372_vm0, %v2133_v60  ;;  %2260 = vst [vmem:[%s2918_s30 + $0x78] sm:$0xff] %v2244_v61  }
 0x15a   : > { %1562 = vst.msk [vmem:[%s2907_s27 + $0x74] sm:$0xf] %vm1372_vm0, %v2131_v62  ;;  %2259 = vst [vmem:[%s2918_s30 + $0x70] sm:$0xff] %v2239_v63  }
 0x15b PF: > { %s20_s11 = sadd.s32 1, %s2579_s11   ;;  %s3077_s30 = smov %s2575_s10 }
 0x15c   : > { %p17_p5 = scmp.ge.s32.totalorder %s20_s11, 4   ;;  %s3078_s10 = smov %s3080_s12 }
 0x15e   :  { %19 = sbr.rel (!%p17_p5) target bundleno = 2 (0x2), region = 102 }

// kernel: self_attention_forward.3
= control target key start
LH: loop header
LB: loop body
LE: loop exit
PB: predicated region body
PF: predicated region fallthrough
CT: control target
= control target key end

     0   :  { %s3241_s0 = inlined_call_operand.vmem [shape: bf16[2,256,16], index: 0, kind: input, shape index: {}]   ;;  %s3242_s1 = inlined_call_operand.vmem [shape: bf16[2,256,16], index: 1, kind: input, shape index: {}]   ;;  %s3243_s2 = inlined_call_operand.vmem [shape: bf16[2,256,128], index: 2, kind: input, shape index: {}]   ;;  %s3244_s3 = inlined_call_operand.vmem [shape: bf16[2,256,128], index: 3, kind: input, shape index: {}]   ;;  %s3245_s4 = inlined_call_operand.<no memory space> [shape: f32[1], index: 4, kind: input, shape index: {}]   ;;  %s3246_s5 = inlined_call_operand.hbm [shape: f32[2,256,128], index: 5, kind: output, shape index: {}]  }
   0x1   :  { %10 = sst [smem:[#allocation2]] %s3245_s4 }
   0x2   :  { %11 = vsyncpa [#allocation4], 0 }
   0x3   :  { %13 = vsyncpa [#allocation4 + $0x1], 0  ;;  %s2662_s20 = smov 0   ;;  %s2664_s21 = smov 0  }
   0x4   :  { %s2666_s22 = smov 0   ;;  %s2668_s23 = smov 0  }
   0x5   :  { %s2670_s24 = smov 0   ;;  %s2672_s25 = smov 0  }
   0x6 LB: > { %s1914_s4 = sadd.s32 4294967295, %s2624_s25   ;;  %s1915_s26 = sadd.s32 4294967294, %s2624_s25   ;;  %s2624_s25 = sphi %s2672_s25, %s19_s25   ;;  %s2620_s24 = sphi %s2670_s24, %s3292_s24   ;;  %s2616_s23 = sphi %s2668_s23, %s3291_s23   ;;  %s2612_s22 = sphi %s2666_s22, %s3290_s22   ;;  %s2608_s21 = sphi %s2664_s21, %s3289_s21   ;;  %s2604_s20 = sphi %s2662_s20, %s3288_s20  }
   0x7   : > { %s31_s27 = sadd.s32 1, %s2620_s24  ;;  %s169_s28 = sadd.s32 1, %s2612_s22 }
   0x8   : > { %p33_p0 = scmp.ge.s32.totalorder %s31_s27, 2  ;;  %p179_p1 = scmp.ne.s32.totalorder %s2612_s22, %s2608_s21 }
   0x9   : > { %p180_p2 = scmp.eq.s32.totalorder %s1914_s4, 1  ;;  %p185_p3 = scmp.ne.s32.totalorder %s2608_s21, %s2604_s20 }
   0xa   : > { %s3294_s27 = smov (%p33_p0, %s31_s27), 0  ;;  %p186_p5 = scmp.eq.s32.totalorder %s1915_s26, 1 }
   0xb   : > { %p2702_p4 = por %p180_p2, %p179_p1  ;;  %s164_s30 = ssub.s32 %s2620_s24, %s3294_s27 }
   0xc   : > { %p1918_p6 = scmp.ge.s32.totalorder %s2624_s25, 1  ;;  %p167_p7 = scmp.eq.s32.totalorder %s164_s30, 0 }
   0xd   : > { %p2709_p8 = por %p186_p5, %p185_p3  ;;  %p249_p9 = scmp.lt.s32.totalorder %s2624_s25, 3 }
   0xe   : > { %s2715_s7 = scalar_select %p167_p7, %s2612_s22, %s169_s28  }
   0xf   : > { %p250_p10 = pnand %p1918_p6, %p249_p9 }
  0x11   : > { %253 = sbr.rel (%p250_p10) target bundleno = 834 (0x342), region = 40 }
  0x18   : > { %p301_p11 = scmp.lt.s32.totalorder %s2616_s23, 1  ;;  %vm556_vm0 = vcmask 130048   ;;  %s1583_s19 = sld [smem:[#allocation2]] }
  0x19   : > { %s297_s30 = sand.u32 1, %s2608_s21   ;;  %s2001_s10 = sshll.u32 %s2616_s23, 12 }
  0x1a   : > { %s302_s8 = scalar_select %p301_p11, %s2616_s23, 1 }
  0x1b   : > { %s3187_s14 = scalar_lea.hbm %s3246_s5, %s2001_s10  ;;  %s2626_s16 = smov [#allocation3]  }
  0x1c   : > { %s2719_s9 = sshll.u32 %s302_s8, 7  ;;  %s1919_s8 = sshll.u32 %s297_s30, 8 }
  0x1d   : > { %s2725_s12 = scalar_lea.vmem %s3242_s1, %s2719_s9  ;;  %s2742_s15 = scalar_lea.vmem %s3241_s0, %s2719_s9 }
  0x1e   : > { %v2306_v0 = vld [vmem:[%s2725_s12 + $0x40] sm:$0xff]   ;;  %v2308_v2 = vld [vmem:[%s2725_s12 + $0x48] sm:$0xff]   ;;  %v2310_v6 = vld [vmem:[%s2725_s12 + $0x50] sm:$0xff]   ;;  %s2817_s18 = scalar_lea.vmem %s3243_s2, %s2719_s9  ;;  %s3095_s28 = scalar_lea.vmem %s3244_s3, %s2719_s9 }
  0x1f   : > { %v2307_v1 = vld [vmem:[%s2725_s12] sm:$0xff]   ;;  %2241 = vmatprep.subr.msk.bf16.mxu0 %vm556_vm0, %v2306_v0  ;;  %v2309_v4 = vld [vmem:[%s2725_s12 + $0x8] sm:$0xff]   ;;  %v2311_v7 = vld [vmem:[%s2725_s12 + $0x10] sm:$0xff]   ;;  %s3106_s9 = scalar_lea.vmem [#allocation3], %s1919_s8  ;;  %s2550_s17 = sshll.u32 %s2626_s16, 4  ;;  %s2551_s17 = int_to_ptr.vmem [resolvable:$false] %s2550_s17 }
  0x20   : > { %v606_v3 = vsel %vm556_vm0, %v2307_v1, 0  ;;  %v609_v5 = vsel %vm556_vm0, %v2309_v4, 0  ;;  %v2322_v8 = vld [vmem:[%s2742_s15] sm:$0xff]   ;;  %v612_v9 = vsel %vm556_vm0, %v2311_v7, 0  ;;  %v2312_v10 = vld [vmem:[%s2725_s12 + $0x58] sm:$0xff]   ;;  %v2316_v16 = vld [vmem:[%s2725_s12 + $0x68] sm:$0xff]  }
  0x21   : > { %2082 = vmatpush3.bf16.xpose.msra.mxu0 %v606_v3  ;;  %2097 = vmatprep.mubr.msk.bf16.mxu0 %vm556_vm0, %v2322_v8  ;;  %v2313_v11 = vld [vmem:[%s2725_s12 + $0x18] sm:$0xff]   ;;  %v2314_v13 = vld [vmem:[%s2725_s12 + $0x60] sm:$0xff]   ;;  %v2317_v17 = vld [vmem:[%s2725_s12 + $0x28] sm:$0xff]   ;;  %s1793_s11 = sshll.u32 %s3106_s9, 4  ;;  %s3189_s11 = int_to_ptr.vmem [resolvable:$true] %s1793_s11 }
  0x22   : > { %2242 = vmatprep.subr.msk.bf16.mxu0 %vm556_vm0, %v2308_v2  ;;  %v615_v12 = vsel %vm556_vm0, %v2313_v11, 0  ;;  %v2315_v14 = vld [vmem:[%s2725_s12 + $0x20] sm:$0xff]   ;;  %v621_v18 = vsel %vm556_vm0, %v2317_v17, 0  ;;  %v2318_v19 = vld [vmem:[%s2725_s12 + $0x70] sm:$0xff]   ;;  %v2320_v22 = vld [vmem:[%s2725_s12 + $0x78] sm:$0xff]   ;;  %s2546_s23 = scalar_lea.vmem %s3189_s11, 4096  ;;  %p2553_p1 = scmp.lt.s32.totalorder %s3189_s11, %s2551_s17 }
  0x23   : > { %v618_v15 = vsel %vm556_vm0, %v2315_v14, 0  ;;  %v2319_v20 = vld [vmem:[%s2725_s12 + $0x30] sm:$0xff]   ;;  %v2321_v23 = vld [vmem:[%s2725_s12 + $0x38] sm:$0xff]   ;;  %v2323_v25 = vld [vmem:[%s2742_s15 + $0x8] sm:$0xff]   ;;  %p2547_p12 = scmp.ne.s32.totalorder %s3189_s11, %s2546_s23 }
  0x24   : > { %v624_v21 = vsel %vm556_vm0, %v2319_v20, 0  ;;  %v627_v24 = vsel %vm556_vm0, %v2321_v23, 0  ;;  %v2324_v26 = vld [vmem:[%s2742_s15 + $0x10] sm:$0xff]   ;;  %v2325_v27 = vld [vmem:[%s2742_s15 + $0x18] sm:$0xff]   ;;  %v2326_v28 = vld [vmem:[%s2742_s15 + $0x20] sm:$0xff]  }
  0x25   : > { %v2327_v29 = vld [vmem:[%s2742_s15 + $0x28] sm:$0xff]   ;;  %v2328_v30 = vld [vmem:[%s2742_s15 + $0x30] sm:$0xff]   ;;  %v2329_v31 = vld [vmem:[%s2742_s15 + $0x38] sm:$0xff]   ;;  %p2548_p13 = pnand %p2547_p12, %p2702_p4 }
  0x26   : > { %v2330_v32 = vld [vmem:[%s2742_s15 + $0x40] sm:$0xff]   ;;  %v2331_v33 = vld [vmem:[%s2742_s15 + $0x48] sm:$0xff]   ;;  %v2332_v34 = vld [vmem:[%s2742_s15 + $0x50] sm:$0xff]  }
  0x27   : > { %v2333_v35 = vld [vmem:[%s2742_s15 + $0x58] sm:$0xff]   ;;  %v2334_v36 = vld [vmem:[%s2742_s15 + $0x60] sm:$0xff]   ;;  %v2335_v37 = vld [vmem:[%s2742_s15 + $0x68] sm:$0xff]   ;;  %p2549_p0 = pneg %p2548_p13 }
  0x28   : > { %v2336_v38 = vld [vmem:[%s2742_s15 + $0x70] sm:$0xff]   ;;  %v2337_v39 = vld [vmem:[%s2742_s15 + $0x78] sm:$0xff]   ;;  %v2338_v40 = vld [vmem:[%s2817_s18 + $0x40] sm:$0xff]   ;;  %s3195_s15 = scalar_lea.sflag [#allocation4], %s297_s30 }
  0x29   : > { %2084 = vmatpush3.bf16.xpose.msra.mxu0 %v609_v5  ;;  %v2339_v42 = vld [vmem:[%s2817_s18] sm:$0xff]   ;;  %2129 = vmatprep.subr.bf16.mxu1 %v2338_v40  ;;  %v2340_v44 = vld [vmem:[%s2817_s18 + $0x48] sm:$0xff]   ;;  %v2342_v49 = vld [vmem:[%s2817_s18 + $0x50] sm:$0xff]  }
  0x2a   : > { %2243 = vmatprep.subr.msk.bf16.mxu0 %vm556_vm0, %v2310_v6  ;;  %2130 = vmatpush3.bf16.msra.mxu1 %v2339_v42  ;;  %v2341_v47 = vld [vmem:[%s2817_s18 + $0x8] sm:$0xff]   ;;  %v2343_v51 = vld [vmem:[%s2817_s18 + $0x10] sm:$0xff]   ;;  %v2344_v63 = vld [vmem:[%s2817_s18 + $0x58] sm:$0xff]  }
  0x2b   : > { %2131 = vmatprep.subr.bf16.mxu1 %v2340_v44  ;;  %v2345_v1 = vld [vmem:[%s2817_s18 + $0x18] sm:$0xff]   ;;  %v2346_v2 = vld [vmem:[%s2817_s18 + $0x60] sm:$0xff]   ;;  %v2349_v11 = vld [vmem:[%s2817_s18 + $0x28] sm:$0xff]  }
  0x2c   : > { %v2347_v4 = vld [vmem:[%s2817_s18 + $0x20] sm:$0xff]   ;;  %v2351_v14 = vld [vmem:[%s2817_s18 + $0x30] sm:$0xff]  }
  0x2e   : > { %2132 = vmatpush3.bf16.msra.mxu1 %v2341_v47 }
  0x2f   : > { %2133 = vmatprep.subr.bf16.mxu1 %v2342_v49 }
  0x31   : > { %2086 = vmatpush3.bf16.xpose.msra.mxu0 %v612_v9  ;;  %v2348_v9 = vld [vmem:[%s2817_s18 + $0x68] sm:$0xff]  }
  0x32   : > { %2244 = vmatprep.subr.msk.bf16.mxu0 %vm556_vm0, %v2312_v10  ;;  %2134 = vmatpush3.bf16.msra.mxu1 %v2343_v51 }
  0x33   : > { %2135 = vmatprep.subr.bf16.mxu1 %v2344_v63 }
  0x36   : > { %2136 = vmatpush3.bf16.msra.mxu1 %v2345_v1 }
  0x37   : > { %2137 = vmatprep.subr.bf16.mxu1 %v2346_v2 }
  0x39   : > { %2088 = vmatpush3.bf16.xpose.msra.mxu0 %v615_v12  ;;  %v2350_v12 = vld [vmem:[%s2817_s18 + $0x70] sm:$0xff]  }
  0x3a   : > { %2245 = vmatprep.subr.msk.bf16.mxu0 %vm556_vm0, %v2314_v13  ;;  %2138 = vmatpush3.bf16.msra.mxu1 %v2347_v4 }
  0x3b   : > { %2139 = vmatprep.subr.bf16.mxu1 %v2348_v9 }
  0x3e   : > { %2140 = vmatpush3.bf16.msra.mxu1 %v2349_v11 }
  0x3f   : > { %2141 = vmatprep.subr.bf16.mxu1 %v2350_v12 }
  0x41   : > { %2090 = vmatpush3.bf16.xpose.msra.mxu0 %v618_v15 }
  0x42   : > { %2246 = vmatprep.subr.msk.bf16.mxu0 %vm556_vm0, %v2316_v16  ;;  %2142 = vmatpush3.bf16.msra.mxu1 %v2351_v14 }
  0x49   : > { %2092 = vmatpush3.bf16.xpose.msra.mxu0 %v621_v18 }
  0x4a   : > { %2247 = vmatprep.subr.msk.bf16.mxu0 %vm556_vm0, %v2318_v19  ;;  %v2352_v19 = vld [vmem:[%s2817_s18 + $0x78] sm:$0xff]  }
  0x4b   : > { %2143 = vmatprep.subr.bf16.mxu1 %v2352_v19 }
  0x51   : > { %2094 = vmatpush3.bf16.xpose.msra.mxu0 %v624_v21  ;;  %v2353_v21 = vld [vmem:[%s2817_s18 + $0x38] sm:$0xff]   ;;  %s2552_s18 = scalar_lea.vmem %s2551_s17, 8192 }
  0x52   : > { %2248 = vmatprep.subr.msk.bf16.mxu0 %vm556_vm0, %v2320_v22  ;;  %2144 = vmatpush3.bf16.msra.mxu1 %v2353_v21  ;;  %p2554_p2 = scmp.lt.s32.totalorder %s2552_s18, %s2546_s23 }
  0x54   : > { %p2555_p3 = por %p2554_p2, %p2553_p1 }
  0x56   : > { %p2556_p5 = pnand %p2555_p3, %p2549_p0 }
  0x59   : > { %2096 = vmatpush3.bf16.xpose.msra.mxu0 %v627_v24 }
  0x60   : > { %2098 = vmatmul.mubr.msk.bf16.vlgmr.msra.gmra.mrb[0].mxu0 %vm556_vm0, %v2322_v8 }
  0x61   : > { %2099 = vmatprep.mubr.msk.bf16.mxu0 %vm556_vm0, %v2323_v25 }
  0x68   : > { %2100 = vmatmul.mubr.msk.bf16.gmra.mrb[4].mxu0 %vm556_vm0, %v2323_v25 }
  0x69   : > { %2101 = vmatprep.mubr.msk.bf16.mxu0 %vm556_vm0, %v2324_v26 }
  0x70   : > { %2102 = vmatmul.mubr.msk.bf16.gmra.mrb[8].mxu0 %vm556_vm0, %v2324_v26 }
  0x71   : > { %2103 = vmatprep.mubr.msk.bf16.mxu0 %vm556_vm0, %v2325_v27 }
  0x78   : > { %2104 = vmatmul.mubr.msk.bf16.gmra.mrb[12].mxu0 %vm556_vm0, %v2325_v27 }
  0x79   : > { %2105 = vmatprep.mubr.msk.bf16.mxu0 %vm556_vm0, %v2326_v28 }
  0x80   : > { %2106 = vmatmul.mubr.msk.bf16.gmra.mrb[16].mxu0 %vm556_vm0, %v2326_v28 }
  0x81   : > { %2107 = vmatprep.mubr.msk.bf16.mxu0 %vm556_vm0, %v2327_v29 }
  0x88   : > { %2108 = vmatmul.mubr.msk.bf16.gmra.mrb[20].mxu0 %vm556_vm0, %v2327_v29 }
  0x89   : > { %2109 = vmatprep.mubr.msk.bf16.mxu0 %vm556_vm0, %v2328_v30 }
  0x90   : > { %2110 = vmatmul.mubr.msk.bf16.gmra.mrb[24].mxu0 %vm556_vm0, %v2328_v30 }
  0x91   : > { %2111 = vmatprep.mubr.msk.bf16.mxu0 %vm556_vm0, %v2329_v31 }
  0x98   : > { %2112 = vmatmul.mubr.msk.bf16.gmra.mrb[28].mxu0 %vm556_vm0, %v2329_v31 }
  0x99   : > { %2113 = vmatprep.mubr.msk.bf16.mxu0 %vm556_vm0, %v2330_v32 }
  0xa0   : > { %2114 = vmatmul.mubr.msk.bf16.gmra.mrb[32].mxu0 %vm556_vm0, %v2330_v32 }
  0xa1   : > { %2115 = vmatprep.mubr.msk.bf16.mxu0 %vm556_vm0, %v2331_v33 }
  0xa8   : > { %2116 = vmatmul.mubr.msk.bf16.gmra.mrb[36].mxu0 %vm556_vm0, %v2331_v33 }
  0xa9   : > { %2117 = vmatprep.mubr.msk.bf16.mxu0 %vm556_vm0, %v2332_v34 }
  0xb0   : > { %2118 = vmatmul.mubr.msk.bf16.gmra.mrb[40].mxu0 %vm556_vm0, %v2332_v34 }
  0xb1   : > { %2119 = vmatprep.mubr.msk.bf16.mxu0 %vm556_vm0, %v2333_v35 }
  0xb8   : > { %2120 = vmatmul.mubr.msk.bf16.gmra.mrb[44].mxu0 %vm556_vm0, %v2333_v35 }
  0xb9   : > { %2121 = vmatprep.mubr.msk.bf16.mxu0 %vm556_vm0, %v2334_v36 }
  0xc0   : > { %2122 = vmatmul.mubr.msk.bf16.gmra.mrb[48].mxu0 %vm556_vm0, %v2334_v36 }
  0xc1   : > { %2123 = vmatprep.mubr.msk.bf16.mxu0 %vm556_vm0, %v2335_v37 }
  0xc8   : > { %2124 = vmatmul.mubr.msk.bf16.gmra.mrb[52].mxu0 %vm556_vm0, %v2335_v37 }
  0xc9   : > { %2125 = vmatprep.mubr.msk.bf16.mxu0 %vm556_vm0, %v2336_v38 }
  0xd0   : > { %2126 = vmatmul.mubr.msk.bf16.gmra.mrb[56].mxu0 %vm556_vm0, %v2336_v38 }
  0xd1   : > { %2127 = vmatprep.mubr.msk.bf16.mxu0 %vm556_vm0, %v2337_v39 }
  0xd8   : > { %2128 = vmatmul.mubr.msk.bf16.gmra.mrb[60].mxu0 %vm556_vm0, %v2337_v39 }
 0x133   : > { %v2820_v41 = vpop.f32.mrb[0].mxu0 }
 0x134   : > { %v2823_v43 = vpop.f32.mrb[1].mxu0 }
 0x135   : > { %v2826_v45 = vpop.f32.mrb[2].mxu0  ;;  %v846_v46 = vmax.f32 %v2820_v41, %v2823_v43 }
 0x136   : > { %v2831_v48 = vpop.f32.mrb[3].mxu0 }
 0x137   : > { %847 = vmax.xlane.f32.xlu0 %v846_v46  ;;  %v849_v50 = vmax.f32 %v2826_v45, %v2831_v48 }
 0x13b   : > { %850 = vmax.xlane.f32.xlu0 %v849_v50  ;;  %v2837_v52 = vpop.f32.mrb[4].mxu0 }
 0x13c   : > { %v2839_v53 = vpop.f32.mrb[5].mxu0 }
 0x13d   : > { %v2841_v54 = vpop.f32.mrb[6].mxu0  ;;  %v852_v55 = vmax.f32 %v2837_v52, %v2839_v53 }
 0x13e   : > { %v2845_v56 = vpop.f32.mrb[7].mxu0 }
 0x13f   : > { %853 = vmax.xlane.f32.xlu1 %v852_v55  ;;  %v855_v57 = vmax.f32 %v2841_v54, %v2845_v56 }
 0x143   : > { %856 = vmax.xlane.f32.xlu1 %v855_v57  ;;  %v2849_v58 = vpop.f32.mrb[8].mxu0 }
 0x144   : > { %v2851_v59 = vpop.f32.mrb[9].mxu0 }
 0x145   : > { %v2853_v60 = vpop.f32.mrb[10].mxu0  ;;  %v858_v61 = vmax.f32 %v2849_v58, %v2851_v59 }
 0x146   : > { %v2857_v62 = vpop.f32.mrb[11].mxu0 }
 0x147   : > { %859 = vmax.xlane.f32.xlu0 %v858_v61  ;;  %v861_v0 = vmax.f32 %v2853_v60, %v2857_v62 }
 0x149   : > { %862 = vmax.xlane.f32.xlu1 %v861_v0 }
 0x14b   : > { %v2864_v3 = vpop.f32.mrb[12].mxu0 }
 0x14c   : > { %v2867_v5 = vpop.f32.mrb[13].mxu0 }
 0x14d   : > { %v2869_v6 = vpop.f32.mrb[14].mxu0  ;;  %v864_v7 = vmax.f32 %v2864_v3, %v2867_v5 }
 0x14e   : > { %v2873_v8 = vpop.f32.mrb[15].mxu0 }
 0x14f   : > { %865 = vmax.xlane.f32.xlu0 %v864_v7  ;;  %v867_v10 = vmax.f32 %v2869_v6, %v2873_v8 }
 0x151   : > { %868 = vmax.xlane.f32.xlu1 %v867_v10 }
 0x153   : > { %v2880_v13 = vpop.f32.mrb[16].mxu0 }
 0x154   : > { %v2883_v15 = vpop.f32.mrb[17].mxu0 }
 0x155   : > { %v2885_v16 = vpop.f32.mrb[18].mxu0  ;;  %v870_v17 = vmax.f32 %v2880_v13, %v2883_v15 }
 0x156   : > { %v2889_v18 = vpop.f32.mrb[19].mxu0 }
 0x157   : > { %871 = vmax.xlane.f32.xlu0 %v870_v17  ;;  %v873_v20 = vmax.f32 %v2885_v16, %v2889_v18 }
 0x159   : > { %874 = vmax.xlane.f32.xlu1 %v873_v20 }
 0x15b   : > { %v2895_v22 = vpop.f32.mrb[20].mxu0 }
 0x15c   : > { %v2897_v23 = vpop.f32.mrb[21].mxu0 }
 0x15d   : > { %v2899_v24 = vpop.f32.mrb[22].mxu0  ;;  %v876_v25 = vmax.f32 %v2895_v22, %v2897_v23 }
 0x15e   : > { %v2903_v26 = vpop.f32.mrb[23].mxu0 }
 0x15f   : > { %877 = vmax.xlane.f32.xlu0 %v876_v25  ;;  %v879_v27 = vmax.f32 %v2899_v24, %v2903_v26 }
 0x161   : > { %880 = vmax.xlane.f32.xlu1 %v879_v27 }
 0x163   : > { %v2907_v28 = vpop.f32.mrb[24].mxu0 }
 0x164   : > { %v2909_v29 = vpop.f32.mrb[25].mxu0 }
 0x165   : > { %v2911_v30 = vpop.f32.mrb[26].mxu0  ;;  %v882_v31 = vmax.f32 %v2907_v28, %v2909_v29 }
 0x166   : > { %v2915_v32 = vpop.f32.mrb[27].mxu0 }
 0x167   : > { %883 = vmax.xlane.f32.xlu0 %v882_v31  ;;  %v885_v33 = vmax.f32 %v2911_v30, %v2915_v32 }
 0x169   : > { %886 = vmax.xlane.f32.xlu1 %v885_v33 }
 0x16b   : > { %v2919_v34 = vpop.f32.mrb[28].mxu0 }
 0x16c   : > { %v2921_v35 = vpop.f32.mrb[29].mxu0 }
 0x16d   : > { %v2923_v36 = vpop.f32.mrb[30].mxu0  ;;  %v888_v37 = vmax.f32 %v2919_v34, %v2921_v35 }
 0x16e   : > { %v2927_v38 = vpop.f32.mrb[31].mxu0 }
 0x16f   : > { %889 = vmax.xlane.f32.xlu0 %v888_v37  ;;  %v891_v39 = vmax.f32 %v2923_v36, %v2927_v38 }
 0x171   : > { %892 = vmax.xlane.f32.xlu1 %v891_v39 }
 0x173   : > { %v2931_v40 = vpop.f32.mrb[32].mxu0 }
 0x174   : > { %v2933_v42 = vpop.f32.mrb[33].mxu0 }
 0x175   : > { %v2935_v44 = vpop.f32.mrb[34].mxu0  ;;  %v894_v46 = vmax.f32 %v2931_v40, %v2933_v42 }
 0x176   : > { %v2939_v47 = vpop.f32.mrb[35].mxu0 }
 0x177   : > { %895 = vmax.xlane.f32.xlu0 %v894_v46  ;;  %v897_v49 = vmax.f32 %v2935_v44, %v2939_v47 }
 0x179   : > { %898 = vmax.xlane.f32.xlu1 %v897_v49 }
 0x17b   : > { %v2943_v50 = vpop.f32.mrb[36].mxu0 }
 0x17c   : > { %v2945_v51 = vpop.f32.mrb[37].mxu0 }
 0x17d   : > { %v2947_v55 = vpop.f32.mrb[38].mxu0  ;;  %v900_v57 = vmax.f32 %v2943_v50, %v2945_v51 }
 0x17e   : > { %v2951_v61 = vpop.f32.mrb[39].mxu0 }
 0x17f   : > { %901 = vmax.xlane.f32.xlu0 %v900_v57  ;;  %v903_v63 = vmax.f32 %v2947_v55, %v2951_v61 }
 0x181   : > { %904 = vmax.xlane.f32.xlu1 %v903_v63 }
 0x183   : > { %v2955_v0 = vpop.f32.mrb[40].mxu0 }
 0x184   : > { %v2957_v1 = vpop.f32.mrb[41].mxu0 }
 0x185   : > { %v2959_v2 = vpop.f32.mrb[42].mxu0  ;;  %v906_v4 = vmax.f32 %v2955_v0, %v2957_v1 }
 0x186   : > { %v2963_v7 = vpop.f32.mrb[43].mxu0 }
 0x187   : > { %907 = vmax.xlane.f32.xlu0 %v906_v4  ;;  %v909_v9 = vmax.f32 %v2959_v2, %v2963_v7 }
 0x189   : > { %910 = vmax.xlane.f32.xlu1 %v909_v9 }
 0x18b   : > { %v2967_v10 = vpop.f32.mrb[44].mxu0 }
 0x18c   : > { %v2969_v11 = vpop.f32.mrb[45].mxu0 }
 0x18d   : > { %v2971_v12 = vpop.f32.mrb[46].mxu0  ;;  %v912_v14 = vmax.f32 %v2967_v10, %v2969_v11 }
 0x18e   : > { %v2975_v17 = vpop.f32.mrb[47].mxu0 }
 0x18f   : > { %913 = vmax.xlane.f32.xlu0 %v912_v14  ;;  %v915_v19 = vmax.f32 %v2971_v12, %v2975_v17 }
 0x191   : > { %916 = vmax.xlane.f32.xlu1 %v915_v19 }
 0x193   : > { %v2979_v20 = vpop.f32.mrb[48].mxu0 }
 0x194   : > { %v2981_v21 = vpop.f32.mrb[49].mxu0 }
 0x195   : > { %3262 = vst [vmem:[#allocation6_spill] sm:$0xff] %v2981_v21  ;;  %v2983_v25 = vpop.f32.mrb[50].mxu0  ;;  %v918_v27 = vmax.f32 %v2979_v20, %v2981_v21 }
 0x196   : > { %3263 = vst [vmem:[#allocation7_spill] sm:$0xff] %v2983_v25  ;;  %v2987_v31 = vpop.f32.mrb[51].mxu0 }
 0x197   : > { %3264 = vst [vmem:[#allocation8_spill] sm:$0xff] %v2987_v31  ;;  %919 = vmax.xlane.f32.xlu0 %v918_v27  ;;  %v921_v33 = vmax.f32 %v2983_v25, %v2987_v31 }
 0x199   : > { %922 = vmax.xlane.f32.xlu1 %v921_v33 }
 0x19b   : > { %v2991_v37 = vpop.f32.mrb[52].mxu0 }
 0x19c   : > { %3265 = vst [vmem:[#allocation9_spill] sm:$0xff] %v2991_v37  ;;  %v2993_v39 = vpop.f32.mrb[53].mxu0 }
 0x19d   : > { %3266 = vst [vmem:[#allocation10_spill] sm:$0xff] %v2993_v39  ;;  %v2995_v46 = vpop.f32.mrb[54].mxu0  ;;  %v924_v49 = vmax.f32 %v2991_v37, %v2993_v39 }
 0x19e   : > { %3267 = vst [vmem:[#allocation11_spill] sm:$0xff] %v2995_v46  ;;  %v2999_v57 = vpop.f32.mrb[55].mxu0 }
 0x19f   : > { %3268 = vst [vmem:[#allocation12_spill] sm:$0xff] %v2999_v57  ;;  %925 = vmax.xlane.f32.xlu0 %v924_v49  ;;  %v927_v63 = vmax.f32 %v2995_v46, %v2999_v57 }
 0x1a1   : > { %928 = vmax.xlane.f32.xlu1 %v927_v63 }
 0x1a3   : > { %v3003_v4 = vpop.f32.mrb[56].mxu0 }
 0x1a4   : > { %3269 = vst [vmem:[#allocation13_spill] sm:$0xff] %v3003_v4  ;;  %v3005_v9 = vpop.f32.mrb[57].mxu0 }
 0x1a5   : > { %3270 = vst [vmem:[#allocation14_spill] sm:$0xff] %v3005_v9  ;;  %v3007_v14 = vpop.f32.mrb[58].mxu0  ;;  %v930_v19 = vmax.f32 %v3003_v4, %v3005_v9 }
 0x1a6   : > { %3271 = vst [vmem:[#allocation15_spill] sm:$0xff] %v3007_v14  ;;  %v3011_v27 = vpop.f32.mrb[59].mxu0 }
 0x1a7   : > { %3272 = vst [vmem:[#allocation16_spill] sm:$0xff] %v3011_v27  ;;  %931 = vmax.xlane.f32.xlu0 %v930_v19  ;;  %v933_v33 = vmax.f32 %v3007_v14, %v3011_v27 }
 0x1a9   : > { %934 = vmax.xlane.f32.xlu1 %v933_v33 }
 0x1ab   : > { %v3015_v49 = vpop.f32.mrb[60].mxu0 }
 0x1ac   : > { %3273 = vst [vmem:[#allocation17_spill] sm:$0xff] %v3015_v49  ;;  %v3017_v57 = vpop.f32.mrb[61].mxu0 }
 0x1ad   : > { %3274 = vst [vmem:[#allocation18_spill] sm:$0xff] %v3017_v57  ;;  %v3019_v63 = vpop.f32.mrb[62].mxu0  ;;  %v936_v46 = vmax.f32 %v3015_v49, %v3017_v57 }
 0x1ae   : > { %v3023_v39 = vpop.f32.mrb[63].mxu0 }
 0x1af   : > { %v939_v9 = vmax.f32 %v3019_v63, %v3023_v39  ;;  %937 = vmax.xlane.f32.xlu0 %v936_v46 }
 0x1b1   : > { %940 = vmax.xlane.f32.xlu1 %v939_v9 }
 0x1c4   : > { %v848_v19 = vpop.xlane.xlu0 %847 }
 0x1c5   : > { %v942_v27 = vsub.f32 %v2820_v41, %v848_v19  ;;  %v943_v33 = vsub.f32 %v2823_v43, %v848_v19 }
 0x1c7   : > { %v1006_v14 = vmul.f32 1.442695, %v942_v27  ;;  %v1008_v4 = vmul.f32 1.442695, %v943_v33 }
 0x1c8   : > { %v851_v37 = vpop.xlane.xlu0 %850 }
 0x1c9   : > { %2354 = vpow2.f32 %v1006_v14  ;;  %v944_v31 = vsub.f32 %v2826_v45, %v851_v37  ;;  %v945_v57 = vsub.f32 %v2831_v48, %v851_v37 }
 0x1ca   : > { %2356 = vpow2.f32 %v1008_v4 }
 0x1cb   : > { %v1010_v49 = vmul.f32 1.442695, %v944_v31  ;;  %v1012_v25 = vmul.f32 1.442695, %v945_v57 }
 0x1cc   : > { %v854_v21 = vpop.xlane.xlu1 %853 }
 0x1cd   : > { %2358 = vpow2.f32 %v1010_v49  ;;  %v946_v46 = vsub.f32 %v2837_v52, %v854_v21  ;;  %v947_v9 = vsub.f32 %v2839_v53, %v854_v21 }
 0x1ce   : > { %2360 = vpow2.f32 %v1012_v25 }
 0x1cf   : > { %v1014_v41 = vmul.f32 1.442695, %v946_v46  ;;  %v1016_v43 = vmul.f32 1.442695, %v947_v9 }
 0x1d0   : > { %v857_v27 = vpop.xlane.xlu1 %856 }
 0x1d1   : > { %2362 = vpow2.f32 %v1014_v41  ;;  %v948_v14 = vsub.f32 %v2841_v54, %v857_v27  ;;  %v949_v45 = vsub.f32 %v2845_v56, %v857_v27 }
 0x1d2   : > { %2364 = vpow2.f32 %v1016_v43 }
 0x1d3   : > { %v2355_v48 = vpop.eup %2354  ;;  %v1018_v37 = vmul.f32 1.442695, %v948_v14  ;;  %v1020_v31 = vmul.f32 1.442695, %v949_v45 }
 0x1d4   : > { %v2357_v57 = vpop.eup %2356  ;;  %v860_v4 = vpop.xlane.xlu0 %859 }
 0x1d5   : > { %2366 = vpow2.f32 %v1018_v37  ;;  %v950_v52 = vsub.f32 %v2849_v58, %v860_v4  ;;  %v951_v53 = vsub.f32 %v2851_v59, %v860_v4  ;;  %v1134_v21 = vadd.f32 %v2357_v57, %v2355_v48 }
 0x1d6   : > { %2368 = vpow2.f32 %v1020_v31  ;;  %v863_v25 = vpop.xlane.xlu1 %862 }
 0x1d7   : > { %v2359_v49 = vpop.eup %2358  ;;  %v1022_v19 = vmul.f32 1.442695, %v950_v52  ;;  %v1024_v33 = vmul.f32 1.442695, %v951_v53  ;;  %v952_v54 = vsub.f32 %v2853_v60, %v863_v25  ;;  %v953_v56 = vsub.f32 %v2857_v62, %v863_v25  ;;  %1135 = vadd.xlane.f32.xlu0 %v1134_v21 }
 0x1d8   : > { %v2361_v46 = vpop.eup %2360  ;;  %v1230_v9 = vpack.c.bf16 %v2359_v49, %v2355_v48 }
 0x1d9   : > { %2370 = vpow2.f32 %v1022_v19  ;;  %v1026_v41 = vmul.f32 1.442695, %v952_v54  ;;  %v1028_v43 = vmul.f32 1.442695, %v953_v56  ;;  %v1231_v27 = vpack.c.bf16 %v2361_v46, %v2357_v57 }
 0x1da   : > { %2372 = vpow2.f32 %v1024_v33  ;;  %v1137_v58 = vadd.f32 %v2361_v46, %v2359_v49 }
 0x1db   : > { %v2363_v59 = vpop.eup %2362  ;;  %2374 = vpow2.f32 %v1026_v41  ;;  %1422 = vmatprep.mubr.bf16.mxu1 %v1231_v27 }
 0x1dc   : > { %v2365_v14 = vpop.eup %2364  ;;  %2376 = vpow2.f32 %v1028_v43  ;;  %1138 = vadd.xlane.f32.xlu1 %v1137_v58  ;;  %1423 = vmatmul.mubr.bf16.vlgmr.msra.gmra.mrb[0].mxu1 %v1230_v9  ;;  %v866_v45 = vpop.xlane.xlu0 %865 }
 0x1dd   : > { %v954_v60 = vsub.f32 %v2864_v3, %v866_v45  ;;  %v955_v62 = vsub.f32 %v2867_v5, %v866_v45  ;;  %v1140_v37 = vadd.f32 %v2365_v14, %v2363_v59 }
 0x1de   : > { %v869_v48 = vpop.xlane.xlu1 %868 }
 0x1df   : > { %v2367_v31 = vpop.eup %2366  ;;  %v1030_v4 = vmul.f32 1.442695, %v954_v60  ;;  %v1032_v52 = vmul.f32 1.442695, %v955_v62  ;;  %v956_v57 = vsub.f32 %v2869_v6, %v869_v48  ;;  %v957_v53 = vsub.f32 %v2873_v8, %v869_v48  ;;  %1141 = vadd.xlane.f32.xlu0 %v1140_v37 }
 0x1e0   : > { %v2369_v21 = vpop.eup %2368  ;;  %v1232_v25 = vpack.c.bf16 %v2367_v31, %v2363_v59 }
 0x1e1   : > { %2378 = vpow2.f32 %v1030_v4  ;;  %v1034_v49 = vmul.f32 1.442695, %v956_v57  ;;  %v1036_v19 = vmul.f32 1.442695, %v957_v53  ;;  %v1233_v33 = vpack.c.bf16 %v2369_v21, %v2365_v14 }
 0x1e2   : > { %2380 = vpow2.f32 %v1032_v52  ;;  %v1143_v3 = vadd.f32 %v2369_v21, %v2367_v31 }
 0x1e3   : > { %v2371_v54 = vpop.eup %2370  ;;  %2382 = vpow2.f32 %v1034_v49  ;;  %1430 = vmatprep.mubr.bf16.mxu1 %v1233_v33 }
 0x1e4   : > { %v2373_v5 = vpop.eup %2372  ;;  %2384 = vpow2.f32 %v1036_v19  ;;  %1144 = vadd.xlane.f32.xlu1 %v1143_v3  ;;  %1431 = vmatmul.mubr.bf16.gmra.mrb[4].mxu1 %v1232_v25  ;;  %v872_v56 = vpop.xlane.xlu0 %871 }
 0x1e5   : > { %v2375_v6 = vpop.eup %2374  ;;  %v958_v8 = vsub.f32 %v2880_v13, %v872_v56  ;;  %v959_v46 = vsub.f32 %v2883_v15, %v872_v56  ;;  %v1146_v9 = vadd.f32 %v2373_v5, %v2371_v54 }
 0x1e6   : > { %v2377_v41 = vpop.eup %2376  ;;  %v875_v43 = vpop.xlane.xlu1 %874  ;;  %v1234_v27 = vpack.c.bf16 %v2375_v6, %v2371_v54 }
 0x1e7   : > { %v1038_v58 = vmul.f32 1.442695, %v958_v8  ;;  %v1040_v59 = vmul.f32 1.442695, %v959_v46  ;;  %v960_v14 = vsub.f32 %v2885_v16, %v875_v43  ;;  %v961_v45 = vsub.f32 %v2889_v18, %v875_v43  ;;  %1147 = vadd.xlane.f32.xlu0 %v1146_v9 }
 0x1e8   : > { %v1235_v60 = vpack.c.bf16 %v2377_v41, %v2373_v5  ;;  %v1149_v62 = vadd.f32 %v2377_v41, %v2375_v6 }
 0x1e9   : > { %2386 = vpow2.f32 %v1038_v58  ;;  %v1042_v37 = vmul.f32 1.442695, %v960_v14  ;;  %v1044_v48 = vmul.f32 1.442695, %v961_v45 }
 0x1ea   : > { %2388 = vpow2.f32 %v1040_v59  ;;  %1438 = vmatprep.mubr.bf16.mxu1 %v1235_v60  ;;  %1150 = vadd.xlane.f32.xlu1 %v1149_v62 }
 0x1eb   : > { %v2379_v13 = vpop.eup %2378  ;;  %2390 = vpow2.f32 %v1042_v37 }
 0x1ec   : > { %v2381_v15 = vpop.eup %2380  ;;  %2392 = vpow2.f32 %v1044_v48  ;;  %1439 = vmatmul.mubr.bf16.gmra.mrb[8].mxu1 %v1234_v27  ;;  %v878_v31 = vpop.xlane.xlu0 %877 }
 0x1ed   : > { %v2383_v4 = vpop.eup %2382  ;;  %v962_v16 = vsub.f32 %v2895_v22, %v878_v31  ;;  %v963_v18 = vsub.f32 %v2897_v23, %v878_v31  ;;  %v1152_v52 = vadd.f32 %v2381_v15, %v2379_v13 }
 0x1ee   : > { %v2385_v57 = vpop.eup %2384  ;;  %v881_v53 = vpop.xlane.xlu1 %880  ;;  %v1236_v21 = vpack.c.bf16 %v2383_v4, %v2379_v13 }
 0x1ef   : > { %v1046_v25 = vmul.f32 1.442695, %v962_v16  ;;  %v1048_v49 = vmul.f32 1.442695, %v963_v18  ;;  %v964_v19 = vsub.f32 %v2899_v24, %v881_v53  ;;  %v965_v33 = vsub.f32 %v2903_v26, %v881_v53  ;;  %1153 = vadd.xlane.f32.xlu0 %v1152_v52 }
 0x1f0   : > { %v1237_v3 = vpack.c.bf16 %v2385_v57, %v2381_v15  ;;  %v1155_v54 = vadd.f32 %v2385_v57, %v2383_v4 }
 0x1f1   : > { %2394 = vpow2.f32 %v1046_v25  ;;  %v1050_v5 = vmul.f32 1.442695, %v964_v19  ;;  %v1052_v56 = vmul.f32 1.442695, %v965_v33 }
 0x1f2   : > { %2396 = vpow2.f32 %v1048_v49  ;;  %1446 = vmatprep.mubr.bf16.mxu1 %v1237_v3  ;;  %1156 = vadd.xlane.f32.xlu1 %v1155_v54 }
 0x1f3   : > { %v2387_v22 = vpop.eup %2386  ;;  %2398 = vpow2.f32 %v1050_v5 }
 0x1f4   : > { %v2389_v23 = vpop.eup %2388  ;;  %2400 = vpow2.f32 %v1052_v56  ;;  %1447 = vmatmul.mubr.bf16.gmra.mrb[12].mxu1 %v1236_v21  ;;  %v884_v6 = vpop.xlane.xlu0 %883 }
 0x1f5   : > { %v2391_v8 = vpop.eup %2390  ;;  %v966_v24 = vsub.f32 %v2907_v28, %v884_v6  ;;  %v967_v26 = vsub.f32 %v2909_v29, %v884_v6  ;;  %v1158_v46 = vadd.f32 %v2389_v23, %v2387_v22 }
 0x1f6   : > { %v2393_v9 = vpop.eup %2392  ;;  %v887_v41 = vpop.xlane.xlu1 %886  ;;  %v1238_v43 = vpack.c.bf16 %v2391_v8, %v2387_v22 }
 0x1f7   : > { %v1054_v27 = vmul.f32 1.442695, %v966_v24  ;;  %v1056_v58 = vmul.f32 1.442695, %v967_v26  ;;  %v968_v59 = vsub.f32 %v2911_v30, %v887_v41  ;;  %v969_v14 = vsub.f32 %v2915_v32, %v887_v41  ;;  %1159 = vadd.xlane.f32.xlu0 %v1158_v46 }
 0x1f8   : > { %v1239_v45 = vpack.c.bf16 %v2393_v9, %v2389_v23  ;;  %v1161_v60 = vadd.f32 %v2393_v9, %v2391_v8 }
 0x1f9   : > { %2402 = vpow2.f32 %v1054_v27  ;;  %v1058_v62 = vmul.f32 1.442695, %v968_v59  ;;  %v1060_v37 = vmul.f32 1.442695, %v969_v14 }
 0x1fa   : > { %2404 = vpow2.f32 %v1056_v58  ;;  %1454 = vmatprep.mubr.bf16.mxu1 %v1239_v45  ;;  %1162 = vadd.xlane.f32.xlu1 %v1161_v60 }
 0x1fb   : > { %v2395_v28 = vpop.eup %2394  ;;  %2406 = vpow2.f32 %v1058_v62 }
 0x1fc   : > { %v2397_v29 = vpop.eup %2396  ;;  %2408 = vpow2.f32 %v1060_v37  ;;  %1455 = vmatmul.mubr.bf16.gmra.mrb[16].mxu1 %v1238_v43  ;;  %v890_v48 = vpop.xlane.xlu0 %889 }
 0x1fd   : > { %v2399_v13 = vpop.eup %2398  ;;  %v970_v30 = vsub.f32 %v2919_v34, %v890_v48  ;;  %v971_v32 = vsub.f32 %v2921_v35, %v890_v48  ;;  %v1164_v15 = vadd.f32 %v2397_v29, %v2395_v28 }
 0x1fe   : > { %v2401_v31 = vpop.eup %2400  ;;  %v893_v4 = vpop.xlane.xlu1 %892  ;;  %v1240_v16 = vpack.c.bf16 %v2399_v13, %v2395_v28 }
 0x1ff   : > { %v1062_v18 = vmul.f32 1.442695, %v970_v30  ;;  %v1064_v52 = vmul.f32 1.442695, %v971_v32  ;;  %v972_v57 = vsub.f32 %v2923_v36, %v893_v4  ;;  %v973_v53 = vsub.f32 %v2927_v38, %v893_v4  ;;  %1165 = vadd.xlane.f32.xlu0 %v1164_v15 }
 0x200   : > { %v1241_v21 = vpack.c.bf16 %v2401_v31, %v2397_v29  ;;  %v1167_v25 = vadd.f32 %v2401_v31, %v2399_v13 }
 0x201   : > { %2410 = vpow2.f32 %v1062_v18  ;;  %v1066_v49 = vmul.f32 1.442695, %v972_v57  ;;  %v1068_v19 = vmul.f32 1.442695, %v973_v53 }
 0x202   : > { %2412 = vpow2.f32 %v1064_v52  ;;  %1462 = vmatprep.mubr.bf16.mxu1 %v1241_v21  ;;  %1168 = vadd.xlane.f32.xlu1 %v1167_v25 }
 0x203   : > { %v2403_v34 = vpop.eup %2402  ;;  %2414 = vpow2.f32 %v1066_v49 }
 0x204   : > { %v2405_v35 = vpop.eup %2404  ;;  %2416 = vpow2.f32 %v1068_v19  ;;  %1463 = vmatmul.mubr.bf16.gmra.mrb[20].mxu1 %v1240_v16  ;;  %v896_v33 = vpop.xlane.xlu0 %895 }
 0x205   : > { %v2407_v3 = vpop.eup %2406  ;;  %v974_v36 = vsub.f32 %v2931_v40, %v896_v33  ;;  %v975_v38 = vsub.f32 %v2933_v42, %v896_v33  ;;  %v1170_v54 = vadd.f32 %v2405_v35, %v2403_v34 }
 0x206   : > { %v2409_v5 = vpop.eup %2408  ;;  %v899_v56 = vpop.xlane.xlu1 %898  ;;  %v1242_v22 = vpack.c.bf16 %v2407_v3, %v2403_v34 }
 0x207   : > { %v1070_v23 = vmul.f32 1.442695, %v974_v36  ;;  %v1072_v6 = vmul.f32 1.442695, %v975_v38  ;;  %v976_v8 = vsub.f32 %v2935_v44, %v899_v56  ;;  %v977_v24 = vsub.f32 %v2939_v47, %v899_v56  ;;  %1171 = vadd.xlane.f32.xlu0 %v1170_v54 }
 0x208   : > { %v1243_v26 = vpack.c.bf16 %v2409_v5, %v2405_v35  ;;  %v1173_v46 = vadd.f32 %v2409_v5, %v2407_v3 }
 0x209   : > { %2418 = vpow2.f32 %v1070_v23  ;;  %v1074_v9 = vmul.f32 1.442695, %v976_v8  ;;  %v1076_v41 = vmul.f32 1.442695, %v977_v24 }
 0x20a   : > { %2420 = vpow2.f32 %v1072_v6  ;;  %1470 = vmatprep.mubr.bf16.mxu1 %v1243_v26  ;;  %1174 = vadd.xlane.f32.xlu1 %v1173_v46 }
 0x20b   : > { %v2411_v40 = vpop.eup %2410  ;;  %2422 = vpow2.f32 %v1074_v9 }
 0x20c   : > { %v2413_v42 = vpop.eup %2412  ;;  %2424 = vpow2.f32 %v1076_v41  ;;  %1471 = vmatmul.mubr.bf16.gmra.mrb[24].mxu1 %v1242_v22  ;;  %v902_v43 = vpop.xlane.xlu0 %901  ;;  %v3275_v41 = vld [vmem:[#allocation6_spill] sm:$0xff] }
 0x20d   : > { %v2415_v27 = vpop.eup %2414  ;;  %v978_v44 = vsub.f32 %v2943_v50, %v902_v43  ;;  %v979_v47 = vsub.f32 %v2945_v51, %v902_v43  ;;  %v1176_v58 = vadd.f32 %v2413_v42, %v2411_v40 }
 0x20e   : > { %v2417_v59 = vpop.eup %2416  ;;  %v905_v14 = vpop.xlane.xlu1 %904  ;;  %v1244_v45 = vpack.c.bf16 %v2415_v27, %v2411_v40 }
 0x20f   : > { %v1078_v60 = vmul.f32 1.442695, %v978_v44  ;;  %v1080_v62 = vmul.f32 1.442695, %v979_v47  ;;  %v980_v37 = vsub.f32 %v2947_v55, %v905_v14  ;;  %v981_v28 = vsub.f32 %v2951_v61, %v905_v14  ;;  %1177 = vadd.xlane.f32.xlu0 %v1176_v58  ;;  %v3276_v58 = vld [vmem:[#allocation7_spill] sm:$0xff]  ;;  %v3277_v14 = vld [vmem:[#allocation8_spill] sm:$0xff] }
 0x210   : > { %v1245_v29 = vpack.c.bf16 %v2417_v59, %v2413_v42  ;;  %v1179_v48 = vadd.f32 %v2417_v59, %v2415_v27 }
 0x211   : > { %2426 = vpow2.f32 %v1078_v60  ;;  %v1082_v13 = vmul.f32 1.442695, %v980_v37  ;;  %v1084_v30 = vmul.f32 1.442695, %v981_v28 }
 0x212   : > { %2428 = vpow2.f32 %v1080_v62  ;;  %1478 = vmatprep.mubr.bf16.mxu1 %v1245_v29  ;;  %1180 = vadd.xlane.f32.xlu1 %v1179_v48 }
 0x213   : > { %v2419_v50 = vpop.eup %2418  ;;  %2430 = vpow2.f32 %v1082_v13 }
 0x214   : > { %v2421_v51 = vpop.eup %2420  ;;  %2432 = vpow2.f32 %v1084_v30  ;;  %1479 = vmatmul.mubr.bf16.gmra.mrb[28].mxu1 %v1244_v45  ;;  %v908_v32 = vpop.xlane.xlu0 %907  ;;  %v3278_v30 = vld [vmem:[#allocation9_spill] sm:$0xff] }
 0x215   : > { %v2423_v15 = vpop.eup %2422  ;;  %v982_v55 = vsub.f32 %v2955_v0, %v908_v32  ;;  %v983_v61 = vsub.f32 %v2957_v1, %v908_v32  ;;  %v1182_v31 = vadd.f32 %v2421_v51, %v2419_v50 }
 0x216   : > { %v2425_v4 = vpop.eup %2424  ;;  %v911_v16 = vpop.xlane.xlu1 %910  ;;  %v1246_v18 = vpack.c.bf16 %v2423_v15, %v2419_v50 }
 0x217   : > { %v1086_v52 = vmul.f32 1.442695, %v982_v55  ;;  %v1088_v57 = vmul.f32 1.442695, %v983_v61  ;;  %v984_v53 = vsub.f32 %v2959_v2, %v911_v16  ;;  %v985_v21 = vsub.f32 %v2963_v7, %v911_v16  ;;  %1183 = vadd.xlane.f32.xlu0 %v1182_v31 }
 0x218   : > { %v1247_v25 = vpack.c.bf16 %v2425_v4, %v2421_v51  ;;  %v1185_v49 = vadd.f32 %v2425_v4, %v2423_v15  ;;  %v3279_v51 = vld [vmem:[#allocation10_spill] sm:$0xff] }
 0x219   : > { %2434 = vpow2.f32 %v1086_v52  ;;  %v1090_v19 = vmul.f32 1.442695, %v984_v53  ;;  %v1092_v34 = vmul.f32 1.442695, %v985_v21 }
 0x21a   : > { %2436 = vpow2.f32 %v1088_v57  ;;  %1486 = vmatprep.mubr.bf16.mxu1 %v1247_v25  ;;  %1186 = vadd.xlane.f32.xlu1 %v1185_v49  ;;  %v3281_v57 = vld [vmem:[#allocation12_spill] sm:$0xff] }
 0x21b   : > { %v2427_v0 = vpop.eup %2426  ;;  %2438 = vpow2.f32 %v1090_v19 }
 0x21c   : > { %v2429_v1 = vpop.eup %2428  ;;  %2440 = vpow2.f32 %v1092_v34  ;;  %1487 = vmatmul.mubr.bf16.gmra.mrb[32].mxu1 %v1246_v18  ;;  %v914_v35 = vpop.xlane.xlu0 %913  ;;  %v3280_v18 = vld [vmem:[#allocation11_spill] sm:$0xff] }
 0x21d   : > { %v2431_v33 = vpop.eup %2430  ;;  %v986_v2 = vsub.f32 %v2967_v10, %v914_v35  ;;  %v987_v7 = vsub.f32 %v2969_v11, %v914_v35  ;;  %v1188_v3 = vadd.f32 %v2429_v1, %v2427_v0 }
 0x21e   : > { %v2433_v36 = vpop.eup %2432  ;;  %v917_v38 = vpop.xlane.xlu1 %916  ;;  %v1248_v54 = vpack.c.bf16 %v2431_v33, %v2427_v0 }
 0x21f   : > { %v1094_v5 = vmul.f32 1.442695, %v986_v2  ;;  %v1096_v56 = vmul.f32 1.442695, %v987_v7  ;;  %v988_v22 = vsub.f32 %v2971_v12, %v917_v38  ;;  %v989_v23 = vsub.f32 %v2975_v17, %v917_v38  ;;  %1189 = vadd.xlane.f32.xlu0 %v1188_v3  ;;  %v3283_v7 = vld [vmem:[#allocation14_spill] sm:$0xff] }
 0x220   : > { %v1249_v6 = vpack.c.bf16 %v2433_v36, %v2429_v1  ;;  %v1191_v8 = vadd.f32 %v2433_v36, %v2431_v33  ;;  %v3282_v33 = vld [vmem:[#allocation13_spill] sm:$0xff] }
 0x221   : > { %2442 = vpow2.f32 %v1094_v5  ;;  %v1098_v24 = vmul.f32 1.442695, %v988_v22  ;;  %v1100_v26 = vmul.f32 1.442695, %v989_v23  ;;  %v3284_v23 = vld [vmem:[#allocation15_spill] sm:$0xff] }
 0x222   : > { %2444 = vpow2.f32 %v1096_v56  ;;  %1494 = vmatprep.mubr.bf16.mxu1 %v1249_v6  ;;  %1192 = vadd.xlane.f32.xlu1 %v1191_v8  ;;  %v3285_v8 = vld [vmem:[#allocation16_spill] sm:$0xff] }
 0x223   : > { %v2435_v10 = vpop.eup %2434  ;;  %2446 = vpow2.f32 %v1098_v24 }
 0x224   : > { %v2437_v11 = vpop.eup %2436  ;;  %2448 = vpow2.f32 %v1100_v26  ;;  %1495 = vmatmul.mubr.bf16.gmra.mrb[36].mxu1 %v1248_v54  ;;  %v920_v46 = vpop.xlane.xlu0 %919 }
 0x225   : > { %v2439_v9 = vpop.eup %2438  ;;  %v990_v12 = vsub.f32 %v2979_v20, %v920_v46  ;;  %v991_v17 = vsub.f32 %v3275_v41, %v920_v46  ;;  %v1194_v40 = vadd.f32 %v2437_v11, %v2435_v10 }
 0x226   : > { %v2441_v42 = vpop.eup %2440  ;;  %v923_v43 = vpop.xlane.xlu1 %922  ;;  %v1250_v27 = vpack.c.bf16 %v2439_v9, %v2435_v10 }
 0x227   : > { %v1102_v44 = vmul.f32 1.442695, %v990_v12  ;;  %v1104_v47 = vmul.f32 1.442695, %v991_v17  ;;  %v992_v59 = vsub.f32 %v3276_v58, %v923_v43  ;;  %v993_v45 = vsub.f32 %v3277_v14, %v923_v43  ;;  %1195 = vadd.xlane.f32.xlu0 %v1194_v40  ;;  %v3286_v40 = vld [vmem:[#allocation17_spill] sm:$0xff]  ;;  %v3287_v43 = vld [vmem:[#allocation18_spill] sm:$0xff] }
 0x228   : > { %v1251_v60 = vpack.c.bf16 %v2441_v42, %v2437_v11  ;;  %v1197_v62 = vadd.f32 %v2441_v42, %v2439_v9 }
 0x229   : > { %2450 = vpow2.f32 %v1102_v44  ;;  %v1106_v37 = vmul.f32 1.442695, %v992_v59  ;;  %v1108_v28 = vmul.f32 1.442695, %v993_v45 }
 0x22a   : > { %2452 = vpow2.f32 %v1104_v47  ;;  %1502 = vmatprep.mubr.bf16.mxu1 %v1251_v60  ;;  %1198 = vadd.xlane.f32.xlu1 %v1197_v62 }
 0x22b   : > { %v2443_v20 = vpop.eup %2442  ;;  %2454 = vpow2.f32 %v1106_v37 }
 0x22c   : > { %v2445_v29 = vpop.eup %2444  ;;  %2456 = vpow2.f32 %v1108_v28  ;;  %1503 = vmatmul.mubr.bf16.gmra.mrb[40].mxu1 %v1250_v27  ;;  %v926_v48 = vpop.xlane.xlu0 %925 }
 0x22d   : > { %v2447_v13 = vpop.eup %2446  ;;  %v994_v50 = vsub.f32 %v3278_v30, %v926_v48  ;;  %v995_v32 = vsub.f32 %v3279_v51, %v926_v48  ;;  %v1200_v15 = vadd.f32 %v2445_v29, %v2443_v20 }
 0x22e   : > { %v2449_v55 = vpop.eup %2448  ;;  %v929_v61 = vpop.xlane.xlu1 %928  ;;  %v1252_v31 = vpack.c.bf16 %v2447_v13, %v2443_v20 }
 0x22f   : > { %v1110_v4 = vmul.f32 1.442695, %v994_v50  ;;  %v1112_v16 = vmul.f32 1.442695, %v995_v32  ;;  %v996_v52 = vsub.f32 %v3280_v18, %v929_v61  ;;  %v997_v53 = vsub.f32 %v3281_v57, %v929_v61  ;;  %1201 = vadd.xlane.f32.xlu0 %v1200_v15 }
 0x230   : > { %v1253_v21 = vpack.c.bf16 %v2449_v55, %v2445_v29  ;;  %v1203_v25 = vadd.f32 %v2449_v55, %v2447_v13 }
 0x231   : > { %2458 = vpow2.f32 %v1110_v4  ;;  %v1114_v49 = vmul.f32 1.442695, %v996_v52  ;;  %v1116_v19 = vmul.f32 1.442695, %v997_v53 }
 0x232   : > { %2460 = vpow2.f32 %v1112_v16  ;;  %1510 = vmatprep.mubr.bf16.mxu1 %v1253_v21  ;;  %1204 = vadd.xlane.f32.xlu1 %v1203_v25 }
 0x233   : > { %v2451_v34 = vpop.eup %2450  ;;  %2462 = vpow2.f32 %v1114_v49 }
 0x234   : > { %v2453_v0 = vpop.eup %2452  ;;  %2464 = vpow2.f32 %v1116_v19  ;;  %1511 = vmatmul.mubr.bf16.gmra.mrb[44].mxu1 %v1252_v31  ;;  %v932_v1 = vpop.xlane.xlu0 %931 }
 0x235   : > { %v2455_v35 = vpop.eup %2454  ;;  %v998_v2 = vsub.f32 %v3282_v33, %v932_v1  ;;  %v999_v3 = vsub.f32 %v3283_v7, %v932_v1  ;;  %v1206_v36 = vadd.f32 %v2453_v0, %v2451_v34  ;;  %v3099_v33 = vstv %s1583_s19 }
 0x236   : > { %v2457_v38 = vpop.eup %2456  ;;  %v935_v54 = vpop.xlane.xlu1 %934  ;;  %v1254_v5 = vpack.c.bf16 %v2455_v35, %v2451_v34  ;;  %v2003_v34 = vld [vmem:[%s3095_s28] sm:$0xff]  }
 0x237   : > { %v1118_v56 = vmul.f32 1.442695, %v998_v2  ;;  %v1120_v22 = vmul.f32 1.442695, %v999_v3  ;;  %v1000_v6 = vsub.f32 %v3284_v23, %v935_v54  ;;  %v1001_v24 = vsub.f32 %v3285_v8, %v935_v54  ;;  %1207 = vadd.xlane.f32.xlu0 %v1206_v36 }
 0x238   : > { %v1255_v26 = vpack.c.bf16 %v2457_v38, %v2453_v0  ;;  %v1209_v10 = vadd.f32 %v2457_v38, %v2455_v35  ;;  %v2004_v3 = vunpack.c.l.bf16 %v2003_v34 }
 0x239   : > { %2466 = vpow2.f32 %v1118_v56  ;;  %v1122_v11 = vmul.f32 1.442695, %v1000_v6  ;;  %v1124_v46 = vmul.f32 1.442695, %v1001_v24 }
 0x23a   : > { %2468 = vpow2.f32 %v1120_v22  ;;  %1518 = vmatprep.mubr.bf16.mxu1 %v1255_v26  ;;  %1210 = vadd.xlane.f32.xlu1 %v1209_v10  ;;  %v2005_v22 = vunpack.c.h.bf16 %v2003_v34  ;;  %v2066_v10 = vld [vmem:[%s3095_s28 + $0x8] sm:$0xff]  }
 0x23b   : > { %v2459_v9 = vpop.eup %2458  ;;  %2470 = vpow2.f32 %v1122_v11 }
 0x23c   : > { %v2461_v12 = vpop.eup %2460  ;;  %2472 = vpow2.f32 %v1124_v46  ;;  %1519 = vmatmul.mubr.bf16.gmra.mrb[48].mxu1 %v1254_v5  ;;  %v938_v41 = vpop.xlane.xlu0 %937 }
 0x23d   : > { %v2463_v17 = vpop.eup %2462  ;;  %v1002_v42 = vsub.f32 %v3286_v40, %v938_v41  ;;  %v1003_v27 = vsub.f32 %v3287_v43, %v938_v41  ;;  %v1212_v44 = vadd.f32 %v2461_v12, %v2459_v9  ;;  %v2008_v40 = vunpack.c.l.bf16 %v2066_v10 }
 0x23e   : > { %v2465_v47 = vpop.eup %2464  ;;  %v941_v58 = vpop.xlane.xlu1 %940  ;;  %v1256_v59 = vpack.c.bf16 %v2463_v17, %v2459_v9 }
 0x23f   : > { %v1126_v14 = vmul.f32 1.442695, %v1002_v42  ;;  %v1128_v45 = vmul.f32 1.442695, %v1003_v27  ;;  %1213 = vadd.xlane.f32.xlu0 %v1212_v44  ;;  %v1004_v60 = vsub.f32 %v3019_v63, %v941_v58  ;;  %v1005_v62 = vsub.f32 %v3023_v39, %v941_v58 }
 0x240   : > { %v1257_v37 = vpack.c.bf16 %v2465_v47, %v2461_v12  ;;  %v1215_v28 = vadd.f32 %v2465_v47, %v2463_v17  ;;  %v2009_v58 = vunpack.c.h.bf16 %v2066_v10 }
 0x241   : > { %2474 = vpow2.f32 %v1126_v14  ;;  %v1130_v20 = vmul.f32 1.442695, %v1004_v60  ;;  %v1132_v29 = vmul.f32 1.442695, %v1005_v62 }
 0x242   : > { %2476 = vpow2.f32 %v1128_v45  ;;  %1526 = vmatprep.mubr.bf16.mxu1 %v1257_v37  ;;  %1216 = vadd.xlane.f32.xlu1 %v1215_v28  ;;  %v2067_v37 = vld [vmem:[%s3095_s28 + $0x10] sm:$0xff]  }
 0x243   : > { %v2467_v48 = vpop.eup %2466  ;;  %2478 = vpow2.f32 %v1130_v20 }
 0x244   : > { %v2469_v13 = vpop.eup %2468  ;;  %2480 = vpow2.f32 %v1132_v29  ;;  %1527 = vmatmul.mubr.bf16.gmra.mrb[52].mxu1 %v1256_v59 }
 0x245   : > { %v2471_v30 = vpop.eup %2470  ;;  %v1218_v50 = vadd.f32 %v2469_v13, %v2467_v48 }
 0x246   : > { %v2473_v51 = vpop.eup %2472  ;;  %v1258_v32 = vpack.c.bf16 %v2471_v30, %v2467_v48 }
 0x247   : > { %1219 = vadd.xlane.f32.xlu0 %v1218_v50  ;;  %v1259_v63 = vpack.c.bf16 %v2473_v51, %v2469_v13  ;;  %v1221_v39 = vadd.f32 %v2473_v51, %v2471_v30  ;;  %v2012_v50 = vunpack.c.l.bf16 %v2067_v37 }
 0x249   : > { %1534 = vmatprep.mubr.bf16.mxu1 %v1259_v63  ;;  %1222 = vadd.xlane.f32.xlu1 %v1221_v39 }
 0x24b   : > { %v2475_v15 = vpop.eup %2474 }
 0x24c   : > { %v2477_v55 = vpop.eup %2476  ;;  %1535 = vmatmul.mubr.bf16.gmra.mrb[56].mxu1 %v1258_v32 }
 0x24d   : > { %v2479_v61 = vpop.eup %2478  ;;  %v1224_v31 = vadd.f32 %v2477_v55, %v2475_v15 }
 0x24e   : > { %v2481_v4 = vpop.eup %2480  ;;  %v1260_v16 = vpack.c.bf16 %v2479_v61, %v2475_v15 }
 0x24f   : > { %1225 = vadd.xlane.f32.xlu0 %v1224_v31  ;;  %v1261_v18 = vpack.c.bf16 %v2481_v4, %v2477_v55  ;;  %v1227_v52 = vadd.f32 %v2481_v4, %v2479_v61  ;;  %v2013_v55 = vunpack.c.h.bf16 %v2067_v37 }
 0x251   : > { %1542 = vmatprep.mubr.bf16.mxu1 %v1261_v18  ;;  %1228 = vadd.xlane.f32.xlu1 %v1227_v52  ;;  %v2068_v52 = vld [vmem:[%s3095_s28 + $0x18] sm:$0xff]  }
 0x252   : > { %v2016_v34 = vunpack.c.l.bf16 %v2068_v52 }
 0x254   : > { %1543 = vmatmul.mubr.bf16.gmra.mrb[60].mxu1 %v1260_v16 }
 0x264   : > { %v1136_v57 = vpop.xlane.xlu0 %1135 }
 0x265   : > { %2482 = vrcp.f32 %v1136_v57 }
 0x269   : > { %v1139_v53 = vpop.xlane.xlu1 %1138 }
 0x26a   : > { %2484 = vrcp.f32 %v1139_v53 }
 0x26c   : > { %v1142_v21 = vpop.xlane.xlu0 %1141 }
 0x26d   : > { %2486 = vrcp.f32 %v1142_v21 }
 0x26f   : > { %v2483_v35 = vpop.eup %2482 }
 0x271   : > { %v1145_v25 = vpop.xlane.xlu1 %1144 }
 0x272   : > { %2488 = vrcp.f32 %v1145_v25 }
 0x274   : > { %v2485_v38 = vpop.eup %2484  ;;  %v1148_v54 = vpop.xlane.xlu0 %1147 }
 0x275   : > { %2490 = vrcp.f32 %v1148_v54 }
 0x277   : > { %v1151_v23 = vpop.xlane.xlu1 %1150  ;;  %v2487_v12 = vpop.eup %2486 }
 0x278   : > { %2492 = vrcp.f32 %v1151_v23 }
 0x27c   : > { %v2489_v43 = vpop.eup %2488  ;;  %v1154_v27 = vpop.xlane.xlu0 %1153 }
 0x27d   : > { %2494 = vrcp.f32 %v1154_v27 }
 0x27f   : > { %v1157_v59 = vpop.xlane.xlu1 %1156  ;;  %v2491_v48 = vpop.eup %2490 }
 0x280   : > { %2496 = vrcp.f32 %v1157_v59 }
 0x282   : > { %v2493_v32 = vpop.eup %2492 }
 0x284   : > { %v1160_v63 = vpop.xlane.xlu0 %1159 }
 0x285   : > { %2498 = vrcp.f32 %v1160_v63 }
 0x287   : > { %v1163_v61 = vpop.xlane.xlu1 %1162  ;;  %v2495_v25 = vpop.eup %2494 }
 0x288   : > { %2500 = vrcp.f32 %v1163_v61 }
 0x2af   : > { %v2145_v49 = vpop.f32.mrb[0].mxu1 }
 0x2b0   : > { %v2146_v19 = vpop.f32.mrb[1].mxu1 }
 0x2b1   : > { %v2147_v0 = vadd.f32 %v2146_v19, %v2145_v49  ;;  %v2148_v1 = vpop.f32.mrb[2].mxu1 }
 0x2b2   : > { %v2149_v2 = vpop.f32.mrb[3].mxu1 }
 0x2b3   : > { %v1584_v7 = vmul.f32 %v2483_v35, %v2147_v0  ;;  %v2150_v36 = vadd.f32 %v2149_v2, %v2148_v1  ;;  %v2497_v1 = vpop.eup %2496  ;;  %v1166_v35 = vpop.xlane.xlu0 %1165 }
 0x2b4   : > { %2502 = vrcp.f32 %v1166_v35 }
 0x2b5   : > { %v1617_v5 = vmul.f32 %v3099_v33, %v1584_v7  ;;  %v1585_v56 = vmul.f32 %v2485_v38, %v2150_v36  ;;  %v1169_v36 = vpop.xlane.xlu1 %1168 }
 0x2b6   : > { %2504 = vrcp.f32 %v1169_v36 }
 0x2b7   : > { %v1713_v6 = vadd.f32 %v2004_v3, %v1617_v5  ;;  %v1618_v8 = vmul.f32 %v3099_v33, %v1585_v56  ;;  %v2151_v24 = vpop.f32.mrb[4].mxu1  ;;  %v2017_v3 = vunpack.c.h.bf16 %v2068_v52 }
 0x2b8   : > { %v2152_v26 = vpop.f32.mrb[5].mxu1 }
 0x2b9   : > { %1745 = vst [vmem:[%s3106_s9] sm:$0xff] %v1713_v6  ;;  %v1714_v11 = vadd.f32 %v2005_v22, %v1618_v8  ;;  %v2153_v46 = vadd.f32 %v2152_v26, %v2151_v24  ;;  %v2154_v9 = vpop.f32.mrb[6].mxu1  ;;  %v2069_v22 = vld [vmem:[%s3095_s28 + $0x20] sm:$0xff]   ;;  %v2499_v24 = vpop.eup %2498 }
 0x2ba   : > { %v2155_v41 = vpop.f32.mrb[7].mxu1 }
 0x2bb   : > { %1746 = vst [vmem:[%s3106_s9 + $0x8] sm:$0xff] %v1714_v11  ;;  %v1586_v17 = vmul.f32 %v2487_v12, %v2153_v46  ;;  %v2156_v42 = vadd.f32 %v2155_v41, %v2154_v9  ;;  %v2020_v11 = vunpack.c.l.bf16 %v2069_v22  ;;  %v2501_v9 = vpop.eup %2500  ;;  %v1172_v12 = vpop.xlane.xlu0 %1171 }
 0x2bc   : > { %2506 = vrcp.f32 %v1172_v12 }
 0x2bd   : > { %v1619_v44 = vmul.f32 %v3099_v33, %v1586_v17  ;;  %v1587_v47 = vmul.f32 %v2489_v43, %v2156_v42  ;;  %v1175_v42 = vpop.xlane.xlu1 %1174 }
 0x2be   : > { %2508 = vrcp.f32 %v1175_v42 }
 0x2bf   : > { %v1715_v14 = vadd.f32 %v2008_v40, %v1619_v44  ;;  %v1620_v45 = vmul.f32 %v3099_v33, %v1587_v47  ;;  %v2157_v60 = vpop.f32.mrb[8].mxu1  ;;  %v2021_v40 = vunpack.c.h.bf16 %v2069_v22 }
 0x2c0   : > { %v2158_v62 = vpop.f32.mrb[9].mxu1 }
 0x2c1   : > { %1747 = vst [vmem:[%s3106_s9 + $0x10] sm:$0xff] %v1715_v14  ;;  %v1716_v28 = vadd.f32 %v2009_v58, %v1620_v45  ;;  %v2159_v20 = vadd.f32 %v2158_v62, %v2157_v60  ;;  %v2160_v29 = vpop.f32.mrb[10].mxu1  ;;  %v2070_v58 = vld [vmem:[%s3095_s28 + $0x28] sm:$0xff]   ;;  %v2503_v60 = vpop.eup %2502 }
 0x2c2   : > { %v2161_v13 = vpop.f32.mrb[11].mxu1 }
 0x2c3   : > { %1748 = vst [vmem:[%s3106_s9 + $0x18] sm:$0xff] %v1716_v28  ;;  %v1588_v30 = vmul.f32 %v2491_v48, %v2159_v20  ;;  %v2162_v51 = vadd.f32 %v2161_v13, %v2160_v29  ;;  %v2024_v28 = vunpack.c.l.bf16 %v2070_v58  ;;  %v2505_v29 = vpop.eup %2504  ;;  %v1178_v48 = vpop.xlane.xlu0 %1177 }
 0x2c4   : > { %2510 = vrcp.f32 %v1178_v48 }
 0x2c5   : > { %v1621_v39 = vmul.f32 %v3099_v33, %v1588_v30  ;;  %v1589_v15 = vmul.f32 %v2493_v32, %v2162_v51  ;;  %v1181_v51 = vpop.xlane.xlu1 %1180 }
 0x2c6   : > { %2512 = vrcp.f32 %v1181_v51 }
 0x2c7   : > { %v1717_v31 = vadd.f32 %v2012_v50, %v1621_v39  ;;  %v1622_v4 = vmul.f32 %v3099_v33, %v1589_v15  ;;  %v2163_v16 = vpop.f32.mrb[12].mxu1  ;;  %v2025_v50 = vunpack.c.h.bf16 %v2070_v58 }
 0x2c8   : > { %v2164_v18 = vpop.f32.mrb[13].mxu1 }
 0x2c9   : > { %1749 = vst [vmem:[%s3106_s9 + $0x20] sm:$0xff] %v1717_v31  ;;  %v1718_v57 = vadd.f32 %v2013_v55, %v1622_v4  ;;  %v2165_v53 = vadd.f32 %v2164_v18, %v2163_v16  ;;  %v2166_v21 = vpop.f32.mrb[14].mxu1  ;;  %v2071_v55 = vld [vmem:[%s3095_s28 + $0x30] sm:$0xff]   ;;  %v2507_v16 = vpop.eup %2506 }
 0x2ca   : > { %v2167_v49 = vpop.f32.mrb[15].mxu1 }
 0x2cb   : > { %1750 = vst [vmem:[%s3106_s9 + $0x28] sm:$0xff] %v1718_v57  ;;  %v1590_v19 = vmul.f32 %v2495_v25, %v2165_v53  ;;  %v2168_v0 = vadd.f32 %v2167_v49, %v2166_v21  ;;  %v2028_v57 = vunpack.c.l.bf16 %v2071_v55  ;;  %v2509_v21 = vpop.eup %2508  ;;  %v1184_v25 = vpop.xlane.xlu0 %1183 }
 0x2cc   : > { %2514 = vrcp.f32 %v1184_v25 }
 0x2cd   : > { %v1623_v2 = vmul.f32 %v3099_v33, %v1590_v19  ;;  %v1591_v7 = vmul.f32 %v2497_v1, %v2168_v0  ;;  %v1187_v0 = vpop.xlane.xlu1 %1186 }
 0x2ce   : > { %2516 = vrcp.f32 %v1187_v0 }
 0x2cf   : > { %v1719_v38 = vadd.f32 %v2016_v34, %v1623_v2  ;;  %v1624_v54 = vmul.f32 %v3099_v33, %v1591_v7  ;;  %v2169_v5 = vpop.f32.mrb[16].mxu1  ;;  %v2029_v34 = vunpack.c.h.bf16 %v2071_v55 }
 0x2d0   : > { %v2170_v56 = vpop.f32.mrb[17].mxu1 }
 0x2d1   : > { %1751 = vst [vmem:[%s3106_s9 + $0x30] sm:$0xff] %v1719_v38  ;;  %v1720_v23 = vadd.f32 %v2017_v3, %v1624_v54  ;;  %v2171_v6 = vadd.f32 %v2170_v56, %v2169_v5  ;;  %v2172_v8 = vpop.f32.mrb[18].mxu1  ;;  %v2072_v3 = vld [vmem:[%s3095_s28 + $0x38] sm:$0xff]   ;;  %v2511_v5 = vpop.eup %2510 }
 0x2d2   : > { %v2173_v26 = vpop.f32.mrb[19].mxu1 }
 0x2d3   : > { %1752 = vst [vmem:[%s3106_s9 + $0x38] sm:$0xff] %v1720_v23  ;;  %v1592_v10 = vmul.f32 %v2499_v24, %v2171_v6  ;;  %v2174_v46 = vadd.f32 %v2173_v26, %v2172_v8  ;;  %v2032_v23 = vunpack.c.l.bf16 %v2072_v3  ;;  %v2513_v8 = vpop.eup %2512  ;;  %v1190_v24 = vpop.xlane.xlu0 %1189 }
 0x2d4   : > { %2518 = vrcp.f32 %v1190_v24 }
 0x2d5   : > { %v1625_v41 = vmul.f32 %v3099_v33, %v1592_v10  ;;  %v1593_v17 = vmul.f32 %v2501_v9, %v2174_v46  ;;  %v1193_v46 = vpop.xlane.xlu1 %1192 }
 0x2d6   : > { %2520 = vrcp.f32 %v1193_v46 }
 0x2d7   : > { %v1721_v43 = vadd.f32 %v2020_v11, %v1625_v41  ;;  %v1626_v27 = vmul.f32 %v3099_v33, %v1593_v17  ;;  %v2175_v44 = vpop.f32.mrb[20].mxu1  ;;  %v2033_v11 = vunpack.c.h.bf16 %v2072_v3 }
 0x2d8   : > { %v2176_v47 = vpop.f32.mrb[21].mxu1 }
 0x2d9   : > { %1753 = vst [vmem:[%s3106_s9 + $0x40] sm:$0xff] %v1721_v43  ;;  %v1722_v59 = vadd.f32 %v2021_v40, %v1626_v27  ;;  %v2177_v14 = vadd.f32 %v2176_v47, %v2175_v44  ;;  %v2178_v45 = vpop.f32.mrb[22].mxu1  ;;  %v2073_v40 = vld [vmem:[%s3095_s28 + $0x40] sm:$0xff]   ;;  %v2515_v44 = vpop.eup %2514 }
 0x2da   : > { %v2179_v62 = vpop.f32.mrb[23].mxu1 }
 0x2db   : > { %1754 = vst [vmem:[%s3106_s9 + $0x48] sm:$0xff] %v1722_v59  ;;  %v1594_v37 = vmul.f32 %v2503_v60, %v2177_v14  ;;  %v2180_v20 = vadd.f32 %v2179_v62, %v2178_v45  ;;  %v2036_v59 = vunpack.c.l.bf16 %v2073_v40  ;;  %v2517_v45 = vpop.eup %2516  ;;  %v1196_v60 = vpop.xlane.xlu0 %1195 }
 0x2dc   : > { %2522 = vrcp.f32 %v1196_v60 }
 0x2dd   : > { %v1627_v13 = vmul.f32 %v3099_v33, %v1594_v37  ;;  %v1595_v30 = vmul.f32 %v2505_v29, %v2180_v20  ;;  %v1199_v20 = vpop.xlane.xlu1 %1198 }
 0x2de   : > { %2524 = vrcp.f32 %v1199_v20 }
 0x2df   : > { %v1723_v32 = vadd.f32 %v2024_v28, %v1627_v13  ;;  %v1628_v63 = vmul.f32 %v3099_v33, %v1595_v30  ;;  %v2181_v39 = vpop.f32.mrb[24].mxu1  ;;  %v2037_v28 = vunpack.c.h.bf16 %v2073_v40 }
 0x2e0   : > { %v2182_v15 = vpop.f32.mrb[25].mxu1 }
 0x2e1   : > { %1755 = vst [vmem:[%s3106_s9 + $0x50] sm:$0xff] %v1723_v32  ;;  %v1724_v61 = vadd.f32 %v2025_v50, %v1628_v63  ;;  %v2183_v31 = vadd.f32 %v2182_v15, %v2181_v39  ;;  %v2184_v4 = vpop.f32.mrb[26].mxu1  ;;  %v2074_v50 = vld [vmem:[%s3095_s28 + $0x48] sm:$0xff]   ;;  %v2519_v39 = vpop.eup %2518 }
 0x2e2   : > { %v2185_v18 = vpop.f32.mrb[27].mxu1 }
 0x2e3   : > { %1756 = vst [vmem:[%s3106_s9 + $0x58] sm:$0xff] %v1724_v61  ;;  %v1596_v52 = vmul.f32 %v2507_v16, %v2183_v31  ;;  %v2186_v53 = vadd.f32 %v2185_v18, %v2184_v4  ;;  %v2040_v61 = vunpack.c.l.bf16 %v2074_v50  ;;  %v2521_v4 = vpop.eup %2520  ;;  %v1202_v16 = vpop.xlane.xlu0 %1201 }
 0x2e4   : > { %2526 = vrcp.f32 %v1202_v16 }
 0x2e5   : > { %v1629_v49 = vmul.f32 %v3099_v33, %v1596_v52  ;;  %v1597_v19 = vmul.f32 %v2509_v21, %v2186_v53  ;;  %v1205_v53 = vpop.xlane.xlu1 %1204 }
 0x2e6   : > { %2528 = vrcp.f32 %v1205_v53 }
 0x2e7   : > { %v1725_v1 = vadd.f32 %v2028_v57, %v1629_v49  ;;  %v1630_v35 = vmul.f32 %v3099_v33, %v1597_v19  ;;  %v2187_v2 = vpop.f32.mrb[28].mxu1  ;;  %v2041_v57 = vunpack.c.h.bf16 %v2074_v50 }
 0x2e8   : > { %v2188_v7 = vpop.f32.mrb[29].mxu1 }
 0x2e9   : > { %1757 = vst [vmem:[%s3106_s9 + $0x60] sm:$0xff] %v1725_v1  ;;  %v1726_v36 = vadd.f32 %v2029_v34, %v1630_v35  ;;  %v2189_v38 = vadd.f32 %v2188_v7, %v2187_v2  ;;  %v2190_v54 = vpop.f32.mrb[30].mxu1  ;;  %v2075_v34 = vld [vmem:[%s3095_s28 + $0x50] sm:$0xff]   ;;  %v2523_v2 = vpop.eup %2522 }
 0x2ea   : > { %v2191_v56 = vpop.f32.mrb[31].mxu1 }
 0x2eb   : > { %1758 = vst [vmem:[%s3106_s9 + $0x68] sm:$0xff] %v1726_v36  ;;  %v1598_v22 = vmul.f32 %v2511_v5, %v2189_v38  ;;  %v2192_v6 = vadd.f32 %v2191_v56, %v2190_v54  ;;  %v2044_v36 = vunpack.c.l.bf16 %v2075_v34  ;;  %v2525_v54 = vpop.eup %2524  ;;  %v1208_v5 = vpop.xlane.xlu0 %1207 }
 0x2ec   : > { %2530 = vrcp.f32 %v1208_v5 }
 0x2ed   : > { %v1631_v26 = vmul.f32 %v3099_v33, %v1598_v22  ;;  %v1599_v10 = vmul.f32 %v2513_v8, %v2192_v6  ;;  %v1211_v6 = vpop.xlane.xlu1 %1210 }
 0x2ee   : > { %2532 = vrcp.f32 %v1211_v6 }
 0x2ef   : > { %v1727_v9 = vadd.f32 %v2032_v23, %v1631_v26  ;;  %v1632_v12 = vmul.f32 %v3099_v33, %v1599_v10  ;;  %v2193_v41 = vpop.f32.mrb[32].mxu1  ;;  %v2045_v23 = vunpack.c.h.bf16 %v2075_v34 }
 0x2f0   : > { %v2194_v17 = vpop.f32.mrb[33].mxu1 }
 0x2f1   : > { %1759 = vst [vmem:[%s3106_s9 + $0x70] sm:$0xff] %v1727_v9  ;;  %v1728_v42 = vadd.f32 %v2033_v11, %v1632_v12  ;;  %v2195_v43 = vadd.f32 %v2194_v17, %v2193_v41  ;;  %v2196_v27 = vpop.f32.mrb[34].mxu1  ;;  %v2076_v11 = vld [vmem:[%s3095_s28 + $0x58] sm:$0xff]   ;;  %v2527_v41 = vpop.eup %2526 }
 0x2f2   : > { %v2197_v47 = vpop.f32.mrb[35].mxu1 }
 0x2f3   : > { %1760 = vst [vmem:[%s3106_s9 + $0x78] sm:$0xff] %v1728_v42  ;;  %v1600_v58 = vmul.f32 %v2515_v44, %v2195_v43  ;;  %v2198_v14 = vadd.f32 %v2197_v47, %v2196_v27  ;;  %v2048_v42 = vunpack.c.l.bf16 %v2076_v11  ;;  %v2529_v27 = vpop.eup %2528  ;;  %v1214_v44 = vpop.xlane.xlu0 %1213 }
 0x2f4   : > { %2534 = vrcp.f32 %v1214_v44 }
 0x2f5   : > { %v1633_v62 = vmul.f32 %v3099_v33, %v1600_v58  ;;  %v1601_v37 = vmul.f32 %v2517_v45, %v2198_v14  ;;  %v1217_v14 = vpop.xlane.xlu1 %1216 }
 0x2f6   : > { %2536 = vrcp.f32 %v1217_v14 }
 0x2f7   : > { %v1729_v29 = vadd.f32 %v2036_v59, %v1633_v62  ;;  %v1634_v48 = vmul.f32 %v3099_v33, %v1601_v37  ;;  %v2199_v13 = vpop.f32.mrb[36].mxu1  ;;  %v2049_v59 = vunpack.c.h.bf16 %v2076_v11 }
 0x2f8   : > { %v2200_v30 = vpop.f32.mrb[37].mxu1 }
 0x2f9   : > { %1761 = vst [vmem:[%s3106_s9 + $0x80] sm:$0xff] %v1729_v29  ;;  %v1730_v51 = vadd.f32 %v2037_v28, %v1634_v48  ;;  %v2201_v32 = vadd.f32 %v2200_v30, %v2199_v13  ;;  %v2202_v63 = vpop.f32.mrb[38].mxu1  ;;  %v2077_v28 = vld [vmem:[%s3095_s28 + $0x60] sm:$0xff]   ;;  %v2531_v13 = vpop.eup %2530 }
 0x2fa   : > { %v2203_v15 = vpop.f32.mrb[39].mxu1 }
 0x2fb   : > { %1762 = vst [vmem:[%s3106_s9 + $0x88] sm:$0xff] %v1730_v51  ;;  %v1602_v55 = vmul.f32 %v2519_v39, %v2201_v32  ;;  %v2204_v31 = vadd.f32 %v2203_v15, %v2202_v63  ;;  %v2052_v51 = vunpack.c.l.bf16 %v2077_v28  ;;  %v2533_v63 = vpop.eup %2532  ;;  %v1220_v39 = vpop.xlane.xlu0 %1219 }
 0x2fc   : > { %2538 = vrcp.f32 %v1220_v39 }
 0x2fd   : > { %v1635_v18 = vmul.f32 %v3099_v33, %v1602_v55  ;;  %v1603_v52 = vmul.f32 %v2521_v4, %v2204_v31  ;;  %v1223_v31 = vpop.xlane.xlu1 %1222 }
 0x2fe   : > { %2540 = vrcp.f32 %v1223_v31 }
 0x2ff   : > { %v1731_v21 = vadd.f32 %v2040_v61, %v1635_v18  ;;  %v1636_v25 = vmul.f32 %v3099_v33, %v1603_v52  ;;  %v2205_v49 = vpop.f32.mrb[40].mxu1  ;;  %v2053_v61 = vunpack.c.h.bf16 %v2077_v28 }
 0x300   : > { %v2206_v19 = vpop.f32.mrb[41].mxu1 }
 0x301   : > { %1763 = vst [vmem:[%s3106_s9 + $0x90] sm:$0xff] %v1731_v21  ;;  %v1732_v0 = vadd.f32 %v2041_v57, %v1636_v25  ;;  %v2207_v1 = vadd.f32 %v2206_v19, %v2205_v49  ;;  %v2208_v35 = vpop.f32.mrb[42].mxu1  ;;  %v2078_v57 = vld [vmem:[%s3095_s28 + $0x68] sm:$0xff]   ;;  %v2535_v49 = vpop.eup %2534 }
 0x302   : > { %v2209_v7 = vpop.f32.mrb[43].mxu1 }
 0x303   : > { %1764 = vst [vmem:[%s3106_s9 + $0x98] sm:$0xff] %v1732_v0  ;;  %v1604_v3 = vmul.f32 %v2523_v2, %v2207_v1  ;;  %v2210_v38 = vadd.f32 %v2209_v7, %v2208_v35  ;;  %v2056_v0 = vunpack.c.l.bf16 %v2078_v57  ;;  %v2537_v35 = vpop.eup %2536  ;;  %v1226_v2 = vpop.xlane.xlu0 %1225 }
 0x304   : > { %2542 = vrcp.f32 %v1226_v2 }
 0x305   : > { %v1637_v56 = vmul.f32 %v3099_v33, %v1604_v3  ;;  %v1605_v22 = vmul.f32 %v2525_v54, %v2210_v38  ;;  %v1229_v38 = vpop.xlane.xlu1 %1228 }
 0x306   : > { %2544 = vrcp.f32 %v1229_v38 }
 0x307   : > { %v1733_v8 = vadd.f32 %v2044_v36, %v1637_v56  ;;  %v1638_v24 = vmul.f32 %v3099_v33, %v1605_v22  ;;  %v2211_v26 = vpop.f32.mrb[44].mxu1  ;;  %v2057_v36 = vunpack.c.h.bf16 %v2078_v57 }
 0x308   : > { %v2212_v10 = vpop.f32.mrb[45].mxu1 }
 0x309   : > { %1765 = vst [vmem:[%s3106_s9 + $0xa0] sm:$0xff] %v1733_v8  ;;  %v1734_v46 = vadd.f32 %v2045_v23, %v1638_v24  ;;  %v2213_v9 = vadd.f32 %v2212_v10, %v2211_v26  ;;  %v2214_v12 = vpop.f32.mrb[46].mxu1  ;;  %v2079_v23 = vld [vmem:[%s3095_s28 + $0x70] sm:$0xff]   ;;  %v2539_v26 = vpop.eup %2538 }
 0x30a   : > { %v2215_v17 = vpop.f32.mrb[47].mxu1 }
 0x30b   : > { %1766 = vst [vmem:[%s3106_s9 + $0xa8] sm:$0xff] %v1734_v46  ;;  %v1606_v40 = vmul.f32 %v2527_v41, %v2213_v9  ;;  %v2216_v43 = vadd.f32 %v2215_v17, %v2214_v12  ;;  %v2060_v46 = vunpack.c.l.bf16 %v2079_v23  ;;  %v2541_v12 = vpop.eup %2540 }
 0x30d   : > { %v1639_v47 = vmul.f32 %v3099_v33, %v1606_v40  ;;  %v1607_v58 = vmul.f32 %v2529_v27, %v2216_v43  ;;  %v2061_v40 = vunpack.c.h.bf16 %v2079_v23 }
 0x30f   : > { %v1735_v45 = vadd.f32 %v2048_v42, %v1639_v47  ;;  %v1640_v60 = vmul.f32 %v3099_v33, %v1607_v58  ;;  %v2217_v62 = vpop.f32.mrb[48].mxu1  ;;  %v2080_v47 = vld [vmem:[%s3095_s28 + $0x78] sm:$0xff]  }
 0x310   : > { %v2218_v37 = vpop.f32.mrb[49].mxu1 }
 0x311   : > { %1767 = vst [vmem:[%s3106_s9 + $0xb0] sm:$0xff] %v1735_v45  ;;  %v1736_v20 = vadd.f32 %v2049_v59, %v1640_v60  ;;  %v2219_v29 = vadd.f32 %v2218_v37, %v2217_v62  ;;  %v2220_v48 = vpop.f32.mrb[50].mxu1  ;;  %v2543_v45 = vpop.eup %2542  ;;  %v2064_v37 = vunpack.c.l.bf16 %v2080_v47 }
 0x312   : > { %v2221_v30 = vpop.f32.mrb[51].mxu1 }
 0x313   : > { %1768 = vst [vmem:[%s3106_s9 + $0xb8] sm:$0xff] %v1736_v20  ;;  %v1608_v50 = vmul.f32 %v2531_v13, %v2219_v29  ;;  %v2222_v32 = vadd.f32 %v2221_v30, %v2220_v48  ;;  %v2545_v20 = vpop.eup %2544  ;;  %v2065_v13 = vunpack.c.h.bf16 %v2080_v47 }
 0x315   : > { %v1641_v15 = vmul.f32 %v3099_v33, %v1608_v50  ;;  %v1609_v55 = vmul.f32 %v2533_v63, %v2222_v32 }
 0x317   : > { %v1737_v4 = vadd.f32 %v2052_v51, %v1641_v15  ;;  %v1642_v16 = vmul.f32 %v3099_v33, %v1609_v55  ;;  %v2223_v18 = vpop.f32.mrb[52].mxu1 }
 0x318   : > { %v2224_v52 = vpop.f32.mrb[53].mxu1 }
 0x319   : > { %1769 = vst [vmem:[%s3106_s9 + $0xc0] sm:$0xff] %v1737_v4  ;;  %v1738_v53 = vadd.f32 %v2053_v61, %v1642_v16  ;;  %v2225_v21 = vadd.f32 %v2224_v52, %v2223_v18  ;;  %v2226_v25 = vpop.f32.mrb[54].mxu1 }
 0x31a   : > { %v2227_v19 = vpop.f32.mrb[55].mxu1 }
 0x31b   : > { %1770 = vst [vmem:[%s3106_s9 + $0xc8] sm:$0xff] %v1738_v53  ;;  %v1610_v34 = vmul.f32 %v2535_v49, %v2225_v21  ;;  %v2228_v1 = vadd.f32 %v2227_v19, %v2226_v25 }
 0x31d   : > { %v1643_v7 = vmul.f32 %v3099_v33, %v1610_v34  ;;  %v1611_v3 = vmul.f32 %v2537_v35, %v2228_v1 }
 0x31f   : > { %v1739_v54 = vadd.f32 %v2056_v0, %v1643_v7  ;;  %v1644_v5 = vmul.f32 %v3099_v33, %v1611_v3  ;;  %v2229_v56 = vpop.f32.mrb[56].mxu1 }
 0x320   : > { %v2230_v22 = vpop.f32.mrb[57].mxu1 }
 0x321   : > { %1771 = vst [vmem:[%s3106_s9 + $0xd0] sm:$0xff] %v1739_v54  ;;  %v1740_v6 = vadd.f32 %v2057_v36, %v1644_v5  ;;  %v2231_v8 = vadd.f32 %v2230_v22, %v2229_v56  ;;  %v2232_v24 = vpop.f32.mrb[58].mxu1 }
 0x322   : > { %v2233_v10 = vpop.f32.mrb[59].mxu1 }
 0x323   : > { %1772 = vst [vmem:[%s3106_s9 + $0xd8] sm:$0xff] %v1740_v6  ;;  %v1612_v11 = vmul.f32 %v2539_v26, %v2231_v8  ;;  %v2234_v9 = vadd.f32 %v2233_v10, %v2232_v24 }
 0x325   : > { %v1645_v41 = vmul.f32 %v3099_v33, %v1612_v11  ;;  %v1613_v17 = vmul.f32 %v2541_v12, %v2234_v9 }
 0x327   : > { %v1741_v42 = vadd.f32 %v2060_v46, %v1645_v41  ;;  %v1646_v43 = vmul.f32 %v3099_v33, %v1613_v17  ;;  %v2235_v27 = vpop.f32.mrb[60].mxu1 }
 0x328   : > { %v2236_v44 = vpop.f32.mrb[61].mxu1 }
 0x329   : > { %1773 = vst [vmem:[%s3106_s9 + $0xe0] sm:$0xff] %v1741_v42  ;;  %v1742_v58 = vadd.f32 %v2061_v40, %v1646_v43  ;;  %v2237_v59 = vadd.f32 %v2236_v44, %v2235_v27  ;;  %v2238_v14 = vpop.f32.mrb[62].mxu1 }
 0x32a   : > { %v2239_v60 = vpop.f32.mrb[63].mxu1 }
 0x32b   : > { %1774 = vst [vmem:[%s3106_s9 + $0xe8] sm:$0xff] %v1742_v58  ;;  %v1614_v62 = vmul.f32 %v2543_v45, %v2237_v59  ;;  %v2240_v28 = vadd.f32 %v2239_v60, %v2238_v14 }
 0x32d   : > { %v1647_v29 = vmul.f32 %v3099_v33, %v1614_v62  ;;  %v1615_v48 = vmul.f32 %v2545_v20, %v2240_v28 }
 0x32f   : > { %v1743_v30 = vadd.f32 %v2064_v37, %v1647_v29  ;;  %v1648_v50 = vmul.f32 %v3099_v33, %v1615_v48 }
 0x331   : > { %1775 = vst [vmem:[%s3106_s9 + $0xf0] sm:$0xff] %v1743_v30  ;;  %v1744_v51 = vadd.f32 %v2065_v13, %v1648_v50 }
 0x333   : > { %1776 = vst [vmem:[%s3106_s9 + $0xf8] sm:$0xff] %v1744_v51 }
 0x334   : > { %2559 = shalt.err (!%p2556_p5)
}
 0x335   : > { %s2560_s19 = scalar_lea.hbm %s3187_s14, 4096  ;;  %s2564_s28 = scalar_lea.hbm %s3246_s5, 8192 }
 0x336   : > { %p2561_p6 = scmp.ne.s32.totalorder %s3187_s14, %s2560_s19  ;;  %p2565_p10 = scmp.lt.u32.totalorder %s3187_s14, %s3246_s5 }
 0x337   : > { %p2566_p11 = scmp.lt.u32.totalorder %s2564_s28, %s2560_s19  ;;  %p2568_p13 = scmp.lt.u32.totalorder %s2560_s19, %s3187_s14 }
 0x338   : > { %p2562_p7 = pnand %p2561_p6, %p2702_p4 }
 0x339   : > { %p2567_p12 = por %p2566_p11, %p2565_p10 }
 0x33a   : > { %p2563_p9 = pneg %p2562_p7 }
 0x33b   : > { %p2569_p0 = por %p2568_p13, %p2567_p12 }
 0x33d   : > { %p2570_p1 = pnand %p2569_p0, %p2563_p9 }
 0x33f   : > { %2573 = shalt.err (!%p2570_p1)
}
 0x340   : > { %s2627_s9 = smov 128   ;;  %s2628_s10 = smov 8  }
 0x341   : > { %2249 = dma.vmem_to_hbm [thread:$0]  (%p2702_p4), %s3189_s11, 4096, %s3187_s14, %s3195_s15, %s2627_s9, %s2627_s9, %s2628_s10  }
 0x342 PF: > { %p2255_p2 = scmp.ge.s32.totalorder %s2624_s25, 2  ;;  %s1808_s12 = sand.u32 1, %s2604_s20  }
 0x343   : > { %s1809_s13 = scalar_lea.sflag [#allocation4], %s1808_s12 }
 0x344   : > { %p2252_p3 = pnand %p2255_p2, %p2709_p8 }
 0x346   : > { %2599 = dma.done.wait (!%p2252_p3), %s1809_s13, 4096  }
 0x347   : > { %2601 = vsyncadd (!%p2252_p3), %s1809_s13, 4294963200  ;;  %s19_s25 = sadd.s32 1, %s2624_s25   ;;  %s3288_s20 = smov %s2608_s21 }
 0x348   : > { %p16_p5 = scmp.ge.s32.totalorder %s19_s25, 4   ;;  %s3289_s21 = smov %s2612_s22 }
 0x349   : > { %s3290_s22 = smov %s2715_s7  ;;  %s3291_s23 = smov %s2620_s24 }
 0x34a   : > { %s3292_s24 = smov %s3294_s27  ;;  %18 = sbr.rel (!%p16_p5) target bundleno = 6 (0x6), region = 84 }
 0x351   :  { %1814 = vsyncpa [#allocation4], 1 }
 0x352   :  { %1816 = vsyncpa [#allocation4 + $0x1], 1 }

</bundles_post_ra>
